<compile_context>
chip_gen: v7x
topology: tpu7x:2x2x1
jax: 0.10.0
libtpu: 0.0.40
codegen_flags: <defaults>
</compile_context>

<pallas_src>
import functools

import jax
import jax.numpy as jnp
from jax import lax
from jax.experimental import pallas as pl
from jax.experimental.pallas import tpu as pltpu

N_IN = 28 * 28
N_CLASSES = 10
N_OUT_PAD = 128          # lane-dense output slab; real classes live in [:, :10]
_NEG_BIG = -1e30


def _round_up(x, m):
    return (x + m - 1) // m * m


def _uniform01(shape, row_offset, seed, salt):
    """Counter-based hash PRNG -> uniform [0, 1) floats (pure jnp/lax ops)."""
    r = lax.broadcasted_iota(jnp.int32, shape, 0) + row_offset
    c = lax.broadcasted_iota(jnp.int32, shape, 1)
    h = r * jnp.int32(shape[1]) + c
    h = h + seed + jnp.int32(salt)
    # murmur3-style finalizer; int32 arithmetic wraps like uint32 for these ops.
    h = h ^ lax.shift_right_logical(h, 16)
    h = h * jnp.int32(-2048144789)      # 0x85ebca6b
    h = h ^ lax.shift_right_logical(h, 13)
    h = h * jnp.int32(-1028477387)      # 0xc2b2ae35
    h = h ^ lax.shift_right_logical(h, 16)
    bits24 = lax.shift_right_logical(h, 8)              # top 24 bits in [0, 2^24)
    return bits24.astype(jnp.float32) * (1.0 / 16777216.0)


def _relu_dropout(h, p, row_offset, seed, salt, training):
    """Fused ReLU + inverted dropout (one select instead of max + where)."""
    if not training:
        return jnp.maximum(h, 0.0)
    u = _uniform01(h.shape, row_offset, seed, salt)
    keep = (u >= p) & (h > 0.0)
    return jnp.where(keep, h * (1.0 / (1.0 - p)), 0.0)


def mlp_kernel(seed_ref, x_ref,
               w1_ref, b1_ref, w2_ref, b2_ref, w3_ref, b3_ref,
               w4_ref, b4_ref, w5_ref, b5_ref,
               out_ref, *, training, block_b):
    seed = seed_ref[0]
    row0 = pl.program_id(0) * block_b   # global batch offset -> per-tile dropout masks

    x = x_ref[...]                       # bf16 (block_b, 784)

    # fc1 + relu + dropout(0.2)
    h = jnp.dot(x, w1_ref[...], preferred_element_type=jnp.float32) + b1_ref[...]
    h = _relu_dropout(h, 0.2, row0, seed, 1, training)

    # fc2 + relu + dropout(0.4)
    h = jnp.dot(h.astype(jnp.bfloat16), w2_ref[...],
                preferred_element_type=jnp.float32) + b2_ref[...]
    h = _relu_dropout(h, 0.4, row0, seed, 2, training)

    # fc3 + relu + dropout(0.2)
    h = jnp.dot(h.astype(jnp.bfloat16), w3_ref[...],
                preferred_element_type=jnp.float32) + b3_ref[...]
    h = _relu_dropout(h, 0.2, row0, seed, 3, training)

    # fc4 + relu
    h = jnp.dot(h.astype(jnp.bfloat16), w4_ref[...],
                preferred_element_type=jnp.float32) + b4_ref[...]
    h = jnp.maximum(h, 0.0)

    # fc5 (padded to 128 cols, pad bias = -1e30) + log_softmax
    logits = jnp.dot(h.astype(jnp.bfloat16), w5_ref[...],
                     preferred_element_type=jnp.float32) + b5_ref[...]
    m = jnp.max(logits, axis=-1, keepdims=True)
    z = logits - m
    lse = jnp.log(jnp.sum(jnp.exp(z), axis=-1, keepdims=True))
    out_ref[...] = z - lse


def init_params(key):
    """Mirror torch nn.Linear default init: U[-1/sqrt(fan_in), 1/sqrt(fan_in)].
    Weights stored as (in, out) so the kernel computes x @ W + b."""
    sizes = [(784, 512), (512, 256), (256, 128), (128, 64), (64, 10)]
    params = []
    for fan_in, fan_out in sizes:
        key, kw, kb = jax.random.split(key, 3)
        bound = 1.0 / float(fan_in) ** 0.5
        w = jax.random.uniform(kw, (fan_in, fan_out), jnp.float32, -bound, bound)
        b = jax.random.uniform(kb, (1, fan_out), jnp.float32, -bound, bound)
        params.append((w, b))
    return params


def fully_connected_net_dropout(x_nchw, params, *, seed=0, training=True, block_b=256):
    b = x_nchw.shape[0]
    x = x_nchw.reshape(b, N_IN).astype(jnp.bfloat16)

    # Batch tile: multiple of 8 sublanes; pad B up so the grid divides evenly.
    bm = min(block_b, _round_up(b, 8))
    b_pad = _round_up(b, bm)
    if b_pad != b:
        x = jnp.pad(x, ((0, b_pad - b), (0, 0)))
    grid = (b_pad // bm,)

    # bf16 weights (f32 accumulation inside the kernel), f32 biases.
    const_map = lambda i, seed_ref: (0, 0)      # weights pinned in VMEM across tiles
    flat, wb_specs = [], []
    for li, (w, bias) in enumerate(params):
        w = w.astype(jnp.bfloat16)
        bias = bias.astype(jnp.float32)
        if li == len(params) - 1:
            # lane-dense final slab: pad to 128 output columns
            w = jnp.pad(w, ((0, 0), (0, N_OUT_PAD - w.shape[1])))
            bias = jnp.pad(bias, ((0, 0), (0, N_OUT_PAD - bias.shape[1])),
                           constant_values=_NEG_BIG)
        flat += [w, bias]
        wb_specs += [pl.BlockSpec(w.shape, const_map),
                     pl.BlockSpec(bias.shape, const_map)]

    seed_arr = jnp.array([seed], dtype=jnp.int32)
    kernel = functools.partial(mlp_kernel, training=training, block_b=bm)

    out_padded = pl.pallas_call(
        kernel,
        out_shape=jax.ShapeDtypeStruct((b_pad, N_OUT_PAD), jnp.float32),
        grid_spec=pltpu.PrefetchScalarGridSpec(
            num_scalar_prefetch=1,
            grid=grid,
            in_specs=[pl.BlockSpec((bm, N_IN), lambda i, seed_ref: (i, 0))] + wb_specs,
            out_specs=pl.BlockSpec((bm, N_OUT_PAD), lambda i, seed_ref: (i, 0)),
        ),
        compiler_params=pltpu.CompilerParams(
            dimension_semantics=("parallel",)),
    )(seed_arr, x, *flat)

    return out_padded[:b, :N_CLASSES]


if __name__ == "__main__":
    key = jax.random.PRNGKey(0)
    k_params, k_x = jax.random.split(key)

    params = init_params(k_params)
    # Batch of 8 MNIST-like inputs, NCHW (B, 1, 28, 28) as the torch module expects.
    x = jax.random.normal(k_x, (8, 1, 28, 28), dtype=jnp.float32)

    # Training mode (dropout active): log_softmax rows must exponentiate-sum to 1.
    out_train = fully_connected_net_dropout(x, params, seed=0, training=True)
    jax.block_until_ready(out_train)
    assert out_train.shape == (8, 10)
    assert bool(jnp.all(jnp.isfinite(out_train)))
    row_sums = jnp.sum(jnp.exp(out_train), axis=1)
    assert bool(jnp.all(jnp.abs(row_sums - 1.0) < 1e-3))

    # Eval mode (no dropout): compare against a pure-JAX reference that uses the
    # same bf16-operands / f32-accumulation recipe.
    out_eval = fully_connected_net_dropout(x, params, seed=0, training=False)
    jax.block_until_ready(out_eval)

    def ref_forward(x_nchw, ps):
        h = x_nchw.reshape(x_nchw.shape[0], N_IN).astype(jnp.bfloat16)
        for li, (w, bias) in enumerate(ps):
            h = jnp.dot(h, w.astype(jnp.bfloat16),
                        preferred_element_type=jnp.float32) + bias
            if li < len(ps) - 1:
                h = jnp.maximum(h, 0.0).astype(jnp.bfloat16)
        return jax.nn.log_softmax(h, axis=-1)

    ref = ref_forward(x, params)
    max_err = float(jnp.max(jnp.abs(out_eval - ref)))
    assert max_err < 2e-2, max_err

    print("KERNEL_OK")
</pallas_src>

<mosaic_0001>
module attributes {stable_mosaic.version = 11 : i64} {
  func.func @mlp_kernel(%arg0: i32, %arg1: memref<1xi32, #tpu.memory_space<smem>>, %arg2: memref<8x784xbf16, #tpu.memory_space<vmem>>, %arg3: memref<784x512xbf16, #tpu.memory_space<vmem>>, %arg4: memref<1x512xf32, #tpu.memory_space<vmem>>, %arg5: memref<512x256xbf16, #tpu.memory_space<vmem>>, %arg6: memref<1x256xf32, #tpu.memory_space<vmem>>, %arg7: memref<256x128xbf16, #tpu.memory_space<vmem>>, %arg8: memref<1x128xf32, #tpu.memory_space<vmem>>, %arg9: memref<128x64xbf16, #tpu.memory_space<vmem>>, %arg10: memref<1x64xf32, #tpu.memory_space<vmem>>, %arg11: memref<64x128xbf16, #tpu.memory_space<vmem>>, %arg12: memref<1x128xf32, #tpu.memory_space<vmem>>, %arg13: memref<8x128xf32, #tpu.memory_space<vmem>>) attributes {dimension_semantics = [#tpu.dimension_semantics<parallel>], iteration_bounds = array<i64: 1>, scalar_prefetch = 1 : i64, scratch_operands = 0 : i64, tpu.core_type = #tpu.core_type<tc>, window_params = [{transform_indices = @transform_0, window_bounds = array<i64: 8, 784>}, {pipeline_mode = #tpu.pipeline_mode<synchronous>, transform_indices = @transform_1, window_bounds = array<i64: 784, 512>}, {pipeline_mode = #tpu.pipeline_mode<synchronous>, transform_indices = @transform_2, window_bounds = array<i64: 1, 512>}, {pipeline_mode = #tpu.pipeline_mode<synchronous>, transform_indices = @transform_3, window_bounds = array<i64: 512, 256>}, {pipeline_mode = #tpu.pipeline_mode<synchronous>, transform_indices = @transform_4, window_bounds = array<i64: 1, 256>}, {pipeline_mode = #tpu.pipeline_mode<synchronous>, transform_indices = @transform_5, window_bounds = array<i64: 256, 128>}, {pipeline_mode = #tpu.pipeline_mode<synchronous>, transform_indices = @transform_6, window_bounds = array<i64: 1, 128>}, {pipeline_mode = #tpu.pipeline_mode<synchronous>, transform_indices = @transform_7, window_bounds = array<i64: 128, 64>}, {pipeline_mode = #tpu.pipeline_mode<synchronous>, transform_indices = @transform_8, window_bounds = array<i64: 1, 64>}, {pipeline_mode = #tpu.pipeline_mode<synchronous>, transform_indices = @transform_9, window_bounds = array<i64: 64, 128>}, {pipeline_mode = #tpu.pipeline_mode<synchronous>, transform_indices = @transform_10, window_bounds = array<i64: 1, 128>}, {transform_indices = @transform_11, window_bounds = array<i64: 8, 128>}]} {
    %c0 = arith.constant 0 : index
    %0 = memref.load %arg1[%c0] : memref<1xi32, #tpu.memory_space<smem>>
    %c8_i32 = arith.constant 8 : i32
    %1 = arith.muli %arg0, %c8_i32 : i32
    %c0_0 = arith.constant 0 : index
    %c0_1 = arith.constant 0 : index
    %2 = vector.load %arg2[%c0_0, %c0_1] : memref<8x784xbf16, #tpu.memory_space<vmem>>, vector<8x784xbf16>
    %c0_2 = arith.constant 0 : index
    %c0_3 = arith.constant 0 : index
    %3 = vector.load %arg3[%c0_2, %c0_3] : memref<784x512xbf16, #tpu.memory_space<vmem>>, vector<784x512xbf16>
    %cst = arith.constant dense<0.000000e+00> : vector<8x512xf32>
    %4 = tpu.matmul %2, %3, %cst {dimension_numbers = #tpu.dot_dimension_numbers<[1], [0], [0], [1], [0, 0, 1, 1], [], []>} : vector<8x784xbf16>, vector<784x512xbf16>, vector<8x512xf32> -> vector<8x512xf32>
    %c0_4 = arith.constant 0 : index
    %c0_5 = arith.constant 0 : index
    %5 = vector.load %arg4[%c0_4, %c0_5] : memref<1x512xf32, #tpu.memory_space<vmem>>, vector<1x512xf32>
    %6 = vector.broadcast %5 : vector<1x512xf32> to vector<8x512xf32>
    %7 = arith.addf %4, %6 : vector<8x512xf32>
    %8 = tpu.iota {dimensions = array<i32: 0>} : vector<8x512xi32>
    %9 = vector.broadcast %1 : i32 to vector<8x512xi32>
    %10 = arith.addi %8, %9 : vector<8x512xi32>
    %11 = tpu.iota {dimensions = array<i32: 1>} : vector<8x512xi32>
    %c512_i32 = arith.constant 512 : i32
    %12 = vector.broadcast %c512_i32 : i32 to vector<8x512xi32>
    %13 = arith.muli %10, %12 : vector<8x512xi32>
    %14 = arith.addi %13, %11 : vector<8x512xi32>
    %15 = vector.broadcast %0 : i32 to vector<8x512xi32>
    %16 = arith.addi %14, %15 : vector<8x512xi32>
    %c1_i32 = arith.constant 1 : i32
    %17 = vector.broadcast %c1_i32 : i32 to vector<8x512xi32>
    %18 = arith.addi %16, %17 : vector<8x512xi32>
    %c16_i32 = arith.constant 16 : i32
    %19 = vector.broadcast %c16_i32 : i32 to vector<8x512xi32>
    %20 = arith.shrui %18, %19 : vector<8x512xi32>
    %21 = arith.xori %18, %20 : vector<8x512xi32>
    %c-2048144789_i32 = arith.constant -2048144789 : i32
    %22 = vector.broadcast %c-2048144789_i32 : i32 to vector<8x512xi32>
    %23 = arith.muli %21, %22 : vector<8x512xi32>
    %c13_i32 = arith.constant 13 : i32
    %24 = vector.broadcast %c13_i32 : i32 to vector<8x512xi32>
    %25 = arith.shrui %23, %24 : vector<8x512xi32>
    %26 = arith.xori %23, %25 : vector<8x512xi32>
    %c-1028477387_i32 = arith.constant -1028477387 : i32
    %27 = vector.broadcast %c-1028477387_i32 : i32 to vector<8x512xi32>
    %28 = arith.muli %26, %27 : vector<8x512xi32>
    %c16_i32_6 = arith.constant 16 : i32
    %29 = vector.broadcast %c16_i32_6 : i32 to vector<8x512xi32>
    %30 = arith.shrui %28, %29 : vector<8x512xi32>
    %31 = arith.xori %28, %30 : vector<8x512xi32>
    %c8_i32_7 = arith.constant 8 : i32
    %32 = vector.broadcast %c8_i32_7 : i32 to vector<8x512xi32>
    %33 = arith.shrui %31, %32 : vector<8x512xi32>
    %34 = arith.sitofp %33 : vector<8x512xi32> to vector<8x512xf32>
    %cst_8 = arith.constant 5.96046448E-8 : f32
    %35 = vector.broadcast %cst_8 : f32 to vector<8x512xf32>
    %36 = arith.mulf %34, %35 : vector<8x512xf32>
    %cst_9 = arith.constant 2.000000e-01 : f32
    %37 = vector.broadcast %cst_9 : f32 to vector<8x512xf32>
    %38 = arith.cmpf oge, %36, %37 : vector<8x512xf32>
    %cst_10 = arith.constant 0.000000e+00 : f32
    %39 = vector.broadcast %cst_10 : f32 to vector<8x512xf32>
    %40 = arith.cmpf ogt, %7, %39 : vector<8x512xf32>
    %41 = arith.andi %38, %40 : vector<8x512xi1>
    %cst_11 = arith.constant 1.250000e+00 : f32
    %42 = vector.broadcast %cst_11 : f32 to vector<8x512xf32>
    %43 = arith.mulf %7, %42 : vector<8x512xf32>
    %cst_12 = arith.constant 0.000000e+00 : f32
    %44 = vector.broadcast %cst_12 : f32 to vector<8x512xf32>
    %45 = arith.select %41, %43, %44 : vector<8x512xi1>, vector<8x512xf32>
    %46 = arith.truncf %45 : vector<8x512xf32> to vector<8x512xbf16>
    %c0_13 = arith.constant 0 : index
    %c0_14 = arith.constant 0 : index
    %47 = vector.load %arg5[%c0_13, %c0_14] : memref<512x256xbf16, #tpu.memory_space<vmem>>, vector<512x256xbf16>
    %cst_15 = arith.constant dense<0.000000e+00> : vector<8x256xf32>
    %48 = tpu.matmul %46, %47, %cst_15 {dimension_numbers = #tpu.dot_dimension_numbers<[1], [0], [0], [1], [0, 0, 1, 1], [], []>} : vector<8x512xbf16>, vector<512x256xbf16>, vector<8x256xf32> -> vector<8x256xf32>
    %c0_16 = arith.constant 0 : index
    %c0_17 = arith.constant 0 : index
    %49 = vector.load %arg6[%c0_16, %c0_17] : memref<1x256xf32, #tpu.memory_space<vmem>>, vector<1x256xf32>
    %50 = vector.broadcast %49 : vector<1x256xf32> to vector<8x256xf32>
    %51 = arith.addf %48, %50 : vector<8x256xf32>
    %52 = tpu.iota {dimensions = array<i32: 0>} : vector<8x256xi32>
    %53 = vector.broadcast %1 : i32 to vector<8x256xi32>
    %54 = arith.addi %52, %53 : vector<8x256xi32>
    %55 = tpu.iota {dimensions = array<i32: 1>} : vector<8x256xi32>
    %c256_i32 = arith.constant 256 : i32
    %56 = vector.broadcast %c256_i32 : i32 to vector<8x256xi32>
    %57 = arith.muli %54, %56 : vector<8x256xi32>
    %58 = arith.addi %57, %55 : vector<8x256xi32>
    %59 = vector.broadcast %0 : i32 to vector<8x256xi32>
    %60 = arith.addi %58, %59 : vector<8x256xi32>
    %c2_i32 = arith.constant 2 : i32
    %61 = vector.broadcast %c2_i32 : i32 to vector<8x256xi32>
    %62 = arith.addi %60, %61 : vector<8x256xi32>
    %c16_i32_18 = arith.constant 16 : i32
    %63 = vector.broadcast %c16_i32_18 : i32 to vector<8x256xi32>
    %64 = arith.shrui %62, %63 : vector<8x256xi32>
    %65 = arith.xori %62, %64 : vector<8x256xi32>
    %c-2048144789_i32_19 = arith.constant -2048144789 : i32
    %66 = vector.broadcast %c-2048144789_i32_19 : i32 to vector<8x256xi32>
    %67 = arith.muli %65, %66 : vector<8x256xi32>
    %c13_i32_20 = arith.constant 13 : i32
    %68 = vector.broadcast %c13_i32_20 : i32 to vector<8x256xi32>
    %69 = arith.shrui %67, %68 : vector<8x256xi32>
    %70 = arith.xori %67, %69 : vector<8x256xi32>
    %c-1028477387_i32_21 = arith.constant -1028477387 : i32
    %71 = vector.broadcast %c-1028477387_i32_21 : i32 to vector<8x256xi32>
    %72 = arith.muli %70, %71 : vector<8x256xi32>
    %c16_i32_22 = arith.constant 16 : i32
    %73 = vector.broadcast %c16_i32_22 : i32 to vector<8x256xi32>
    %74 = arith.shrui %72, %73 : vector<8x256xi32>
    %75 = arith.xori %72, %74 : vector<8x256xi32>
    %c8_i32_23 = arith.constant 8 : i32
    %76 = vector.broadcast %c8_i32_23 : i32 to vector<8x256xi32>
    %77 = arith.shrui %75, %76 : vector<8x256xi32>
    %78 = arith.sitofp %77 : vector<8x256xi32> to vector<8x256xf32>
    %cst_24 = arith.constant 5.96046448E-8 : f32
    %79 = vector.broadcast %cst_24 : f32 to vector<8x256xf32>
    %80 = arith.mulf %78, %79 : vector<8x256xf32>
    %cst_25 = arith.constant 4.000000e-01 : f32
    %81 = vector.broadcast %cst_25 : f32 to vector<8x256xf32>
    %82 = arith.cmpf oge, %80, %81 : vector<8x256xf32>
    %cst_26 = arith.constant 0.000000e+00 : f32
    %83 = vector.broadcast %cst_26 : f32 to vector<8x256xf32>
    %84 = arith.cmpf ogt, %51, %83 : vector<8x256xf32>
    %85 = arith.andi %82, %84 : vector<8x256xi1>
    %cst_27 = arith.constant 1.66666663 : f32
    %86 = vector.broadcast %cst_27 : f32 to vector<8x256xf32>
    %87 = arith.mulf %51, %86 : vector<8x256xf32>
    %cst_28 = arith.constant 0.000000e+00 : f32
    %88 = vector.broadcast %cst_28 : f32 to vector<8x256xf32>
    %89 = arith.select %85, %87, %88 : vector<8x256xi1>, vector<8x256xf32>
    %90 = arith.truncf %89 : vector<8x256xf32> to vector<8x256xbf16>
    %c0_29 = arith.constant 0 : index
    %c0_30 = arith.constant 0 : index
    %91 = vector.load %arg7[%c0_29, %c0_30] : memref<256x128xbf16, #tpu.memory_space<vmem>>, vector<256x128xbf16>
    %cst_31 = arith.constant dense<0.000000e+00> : vector<8x128xf32>
    %92 = tpu.matmul %90, %91, %cst_31 {dimension_numbers = #tpu.dot_dimension_numbers<[1], [0], [0], [1], [0, 0, 1, 1], [], []>} : vector<8x256xbf16>, vector<256x128xbf16>, vector<8x128xf32> -> vector<8x128xf32>
    %c0_32 = arith.constant 0 : index
    %c0_33 = arith.constant 0 : index
    %93 = vector.load %arg8[%c0_32, %c0_33] : memref<1x128xf32, #tpu.memory_space<vmem>>, vector<1x128xf32>
    %94 = vector.broadcast %93 : vector<1x128xf32> to vector<8x128xf32>
    %95 = arith.addf %92, %94 : vector<8x128xf32>
    %96 = tpu.iota {dimensions = array<i32: 0>} : vector<8x128xi32>
    %97 = vector.broadcast %1 : i32 to vector<8x128xi32>
    %98 = arith.addi %96, %97 : vector<8x128xi32>
    %99 = tpu.iota {dimensions = array<i32: 1>} : vector<8x128xi32>
    %c128_i32 = arith.constant 128 : i32
    %100 = vector.broadcast %c128_i32 : i32 to vector<8x128xi32>
    %101 = arith.muli %98, %100 : vector<8x128xi32>
    %102 = arith.addi %101, %99 : vector<8x128xi32>
    %103 = vector.broadcast %0 : i32 to vector<8x128xi32>
    %104 = arith.addi %102, %103 : vector<8x128xi32>
    %c3_i32 = arith.constant 3 : i32
    %105 = vector.broadcast %c3_i32 : i32 to vector<8x128xi32>
    %106 = arith.addi %104, %105 : vector<8x128xi32>
    %c16_i32_34 = arith.constant 16 : i32
    %107 = vector.broadcast %c16_i32_34 : i32 to vector<8x128xi32>
    %108 = arith.shrui %106, %107 : vector<8x128xi32>
    %109 = arith.xori %106, %108 : vector<8x128xi32>
    %c-2048144789_i32_35 = arith.constant -2048144789 : i32
    %110 = vector.broadcast %c-2048144789_i32_35 : i32 to vector<8x128xi32>
    %111 = arith.muli %109, %110 : vector<8x128xi32>
    %c13_i32_36 = arith.constant 13 : i32
    %112 = vector.broadcast %c13_i32_36 : i32 to vector<8x128xi32>
    %113 = arith.shrui %111, %112 : vector<8x128xi32>
    %114 = arith.xori %111, %113 : vector<8x128xi32>
    %c-1028477387_i32_37 = arith.constant -1028477387 : i32
    %115 = vector.broadcast %c-1028477387_i32_37 : i32 to vector<8x128xi32>
    %116 = arith.muli %114, %115 : vector<8x128xi32>
    %c16_i32_38 = arith.constant 16 : i32
    %117 = vector.broadcast %c16_i32_38 : i32 to vector<8x128xi32>
    %118 = arith.shrui %116, %117 : vector<8x128xi32>
    %119 = arith.xori %116, %118 : vector<8x128xi32>
    %c8_i32_39 = arith.constant 8 : i32
    %120 = vector.broadcast %c8_i32_39 : i32 to vector<8x128xi32>
    %121 = arith.shrui %119, %120 : vector<8x128xi32>
    %122 = arith.sitofp %121 : vector<8x128xi32> to vector<8x128xf32>
    %cst_40 = arith.constant 5.96046448E-8 : f32
    %123 = vector.broadcast %cst_40 : f32 to vector<8x128xf32>
    %124 = arith.mulf %122, %123 : vector<8x128xf32>
    %cst_41 = arith.constant 2.000000e-01 : f32
    %125 = vector.broadcast %cst_41 : f32 to vector<8x128xf32>
    %126 = arith.cmpf oge, %124, %125 : vector<8x128xf32>
    %cst_42 = arith.constant 0.000000e+00 : f32
    %127 = vector.broadcast %cst_42 : f32 to vector<8x128xf32>
    %128 = arith.cmpf ogt, %95, %127 : vector<8x128xf32>
    %129 = arith.andi %126, %128 : vector<8x128xi1>
    %cst_43 = arith.constant 1.250000e+00 : f32
    %130 = vector.broadcast %cst_43 : f32 to vector<8x128xf32>
    %131 = arith.mulf %95, %130 : vector<8x128xf32>
    %cst_44 = arith.constant 0.000000e+00 : f32
    %132 = vector.broadcast %cst_44 : f32 to vector<8x128xf32>
    %133 = arith.select %129, %131, %132 : vector<8x128xi1>, vector<8x128xf32>
    %134 = arith.truncf %133 : vector<8x128xf32> to vector<8x128xbf16>
    %c0_45 = arith.constant 0 : index
    %c0_46 = arith.constant 0 : index
    %135 = vector.load %arg9[%c0_45, %c0_46] : memref<128x64xbf16, #tpu.memory_space<vmem>>, vector<128x64xbf16>
    %cst_47 = arith.constant dense<0.000000e+00> : vector<8x64xf32>
    %136 = tpu.matmul %134, %135, %cst_47 {dimension_numbers = #tpu.dot_dimension_numbers<[1], [0], [0], [1], [0, 0, 1, 1], [], []>} : vector<8x128xbf16>, vector<128x64xbf16>, vector<8x64xf32> -> vector<8x64xf32>
    %c0_48 = arith.constant 0 : index
    %c0_49 = arith.constant 0 : index
    %137 = vector.load %arg10[%c0_48, %c0_49] : memref<1x64xf32, #tpu.memory_space<vmem>>, vector<1x64xf32>
    %138 = vector.broadcast %137 : vector<1x64xf32> to vector<8x64xf32>
    %139 = arith.addf %136, %138 : vector<8x64xf32>
    %cst_50 = arith.constant 0.000000e+00 : f32
    %140 = vector.broadcast %cst_50 : f32 to vector<8x64xf32>
    %141 = arith.maximumf %139, %140 : vector<8x64xf32>
    %142 = arith.truncf %141 : vector<8x64xf32> to vector<8x64xbf16>
    %c0_51 = arith.constant 0 : index
    %c0_52 = arith.constant 0 : index
    %143 = vector.load %arg11[%c0_51, %c0_52] : memref<64x128xbf16, #tpu.memory_space<vmem>>, vector<64x128xbf16>
    %cst_53 = arith.constant dense<0.000000e+00> : vector<8x128xf32>
    %144 = tpu.matmul %142, %143, %cst_53 {dimension_numbers = #tpu.dot_dimension_numbers<[1], [0], [0], [1], [0, 0, 1, 1], [], []>} : vector<8x64xbf16>, vector<64x128xbf16>, vector<8x128xf32> -> vector<8x128xf32>
    %c0_54 = arith.constant 0 : index
    %c0_55 = arith.constant 0 : index
    %145 = vector.load %arg12[%c0_54, %c0_55] : memref<1x128xf32, #tpu.memory_space<vmem>>, vector<1x128xf32>
    %146 = vector.broadcast %145 : vector<1x128xf32> to vector<8x128xf32>
    %147 = arith.addf %144, %146 : vector<8x128xf32>
    %cst_56 = arith.constant dense<0xFF800000> : vector<8xf32>
    %148 = vector.multi_reduction <maximumf>, %147, %cst_56 [1] : vector<8x128xf32> to vector<8xf32>
    %149 = vector.shape_cast %148 : vector<8xf32> to vector<8x1xf32>
    %150 = vector.broadcast %149 : vector<8x1xf32> to vector<8x128xf32>
    %151 = arith.subf %147, %150 : vector<8x128xf32>
    %152 = math.exp %151 : vector<8x128xf32>
    %cst_57 = arith.constant dense<0.000000e+00> : vector<8xf32>
    %153 = vector.multi_reduction <add>, %152, %cst_57 [1] : vector<8x128xf32> to vector<8xf32>
    %154 = vector.shape_cast %153 : vector<8xf32> to vector<8x1xf32>
    %155 = math.log %154 : vector<8x1xf32>
    %156 = vector.broadcast %155 : vector<8x1xf32> to vector<8x128xf32>
    %157 = arith.subf %151, %156 : vector<8x128xf32>
    %c0_58 = arith.constant 0 : index
    %c0_59 = arith.constant 0 : index
    %158 = vector.load %arg13[%c0_58, %c0_59] : memref<8x128xf32, #tpu.memory_space<vmem>>, vector<8x128xf32>
    tpu.vector_store %arg13[%c0_58, %c0_59], %157 {strides = array<i32>} : memref<8x128xf32, #tpu.memory_space<vmem>>, vector<8x128xf32>,
    return
  }
  func.func @transform_0(%arg0: i32, %arg1: memref<1xi32, #tpu.memory_space<smem>>) -> (i32, i32) {
    %c0_i32 = arith.constant 0 : i32
    %c0_i32_0 = arith.constant 0 : i32
    return %arg0, %c0_i32 : i32, i32
  }
  func.func @transform_1(%arg0: i32, %arg1: memref<1xi32, #tpu.memory_space<smem>>) -> (i32, i32) {
    %c0_i32 = arith.constant 0 : i32
    %c0_i32_0 = arith.constant 0 : i32
    %c0_i32_1 = arith.constant 0 : i32
    return %c0_i32, %c0_i32_0 : i32, i32
  }
  func.func @transform_2(%arg0: i32, %arg1: memref<1xi32, #tpu.memory_space<smem>>) -> (i32, i32) {
    %c0_i32 = arith.constant 0 : i32
    %c0_i32_0 = arith.constant 0 : i32
    %c0_i32_1 = arith.constant 0 : i32
    return %c0_i32, %c0_i32_0 : i32, i32
  }
  func.func @transform_3(%arg0: i32, %arg1: memref<1xi32, #tpu.memory_space<smem>>) -> (i32, i32) {
    %c0_i32 = arith.constant 0 : i32
    %c0_i32_0 = arith.constant 0 : i32
    %c0_i32_1 = arith.constant 0 : i32
    return %c0_i32, %c0_i32_0 : i32, i32
  }
  func.func @transform_4(%arg0: i32, %arg1: memref<1xi32, #tpu.memory_space<smem>>) -> (i32, i32) {
    %c0_i32 = arith.constant 0 : i32
    %c0_i32_0 = arith.constant 0 : i32
    %c0_i32_1 = arith.constant 0 : i32
    return %c0_i32, %c0_i32_0 : i32, i32
  }
  func.func @transform_5(%arg0: i32, %arg1: memref<1xi32, #tpu.memory_space<smem>>) -> (i32, i32) {
    %c0_i32 = arith.constant 0 : i32
    %c0_i32_0 = arith.constant 0 : i32
    %c0_i32_1 = arith.constant 0 : i32
    return %c0_i32, %c0_i32_0 : i32, i32
  }
  func.func @transform_6(%arg0: i32, %arg1: memref<1xi32, #tpu.memory_space<smem>>) -> (i32, i32) {
    %c0_i32 = arith.constant 0 : i32
    %c0_i32_0 = arith.constant 0 : i32
    %c0_i32_1 = arith.constant 0 : i32
    return %c0_i32, %c0_i32_0 : i32, i32
  }
  func.func @transform_7(%arg0: i32, %arg1: memref<1xi32, #tpu.memory_space<smem>>) -> (i32, i32) {
    %c0_i32 = arith.constant 0 : i32
    %c0_i32_0 = arith.constant 0 : i32
    %c0_i32_1 = arith.constant 0 : i32
    return %c0_i32, %c0_i32_0 : i32, i32
  }
  func.func @transform_8(%arg0: i32, %arg1: memref<1xi32, #tpu.memory_space<smem>>) -> (i32, i32) {
    %c0_i32 = arith.constant 0 : i32
    %c0_i32_0 = arith.constant 0 : i32
    %c0_i32_1 = arith.constant 0 : i32
    return %c0_i32, %c0_i32_0 : i32, i32
  }
  func.func @transform_9(%arg0: i32, %arg1: memref<1xi32, #tpu.memory_space<smem>>) -> (i32, i32) {
    %c0_i32 = arith.constant 0 : i32
    %c0_i32_0 = arith.constant 0 : i32
    %c0_i32_1 = arith.constant 0 : i32
    return %c0_i32, %c0_i32_0 : i32, i32
  }
  func.func @transform_10(%arg0: i32, %arg1: memref<1xi32, #tpu.memory_space<smem>>) -> (i32, i32) {
    %c0_i32 = arith.constant 0 : i32
    %c0_i32_0 = arith.constant 0 : i32
    %c0_i32_1 = arith.constant 0 : i32
    return %c0_i32, %c0_i32_0 : i32, i32
  }
  func.func @transform_11(%arg0: i32, %arg1: memref<1xi32, #tpu.memory_space<smem>>) -> (i32, i32) {
    %c0_i32 = arith.constant 0 : i32
    %c0_i32_0 = arith.constant 0 : i32
    return %arg0, %c0_i32 : i32, i32
  }
}

</mosaic_0001>

<bundles_post_ra>
// kernel: tpu_custom_call.1
= control target key start
LH: loop header
LB: loop body
LE: loop exit
PB: predicated region body
PF: predicated region fallthrough
CT: control target
= control target key end

     0   :  { %18 = vsyncpa [#allocation5], 0  ;;  %s3920_s0 = inlined_call_operand.<no memory space> [shape: s32[1], index: 0, kind: input, shape index: {}]   ;;  %s3921_s1 = inlined_call_operand.vmem [shape: bf16[8,784], index: 1, kind: input, shape index: {}]   ;;  %s3922_s2 = inlined_call_operand.hbm [shape: bf16[784,512], index: 2, kind: input, shape index: {}]   ;;  %s3923_s3 = inlined_call_operand.vmem [shape: f32[1,512], index: 3, kind: input, shape index: {}]   ;;  %s3924_s4 = inlined_call_operand.hbm [shape: bf16[512,256], index: 4, kind: input, shape index: {}]   ;;  %s3925_s5 = inlined_call_operand.vmem [shape: f32[1,256], index: 5, kind: input, shape index: {}]   ;;  %s3926_s6 = inlined_call_operand.hbm [shape: bf16[256,128], index: 6, kind: input, shape index: {}]   ;;  %s3927_s7 = inlined_call_operand.vmem [shape: f32[1,128], index: 7, kind: input, shape index: {}]   ;;  %s3928_s8 = inlined_call_operand.vmem [shape: bf16[128,64], index: 8, kind: input, shape index: {}]   ;;  %s3929_s9 = inlined_call_operand.vmem [shape: f32[1,64], index: 9, kind: input, shape index: {}]   ;;  %s3930_s10 = inlined_call_operand.vmem [shape: bf16[64,128], index: 10, kind: input, shape index: {}]   ;;  %s3931_s11 = inlined_call_operand.vmem [shape: f32[1,128], index: 11, kind: input, shape index: {}]   ;;  %s3932_s12 = inlined_call_operand.hbm [shape: f32[8,128], index: 12, kind: output, shape index: {}]  }
   0x1   :  { %19 = vsyncpa [#allocation8], 0 }
   0x2   :  { %20 = vsyncpa [#allocation6], 0  ;;  %s3631_s21 = smov [#allocation7]   ;;  %s3537_s25 = scalar_lea.hbm %s3924_s4, 8192 }
   0x3   :  { %s42_s22 = sshll.u32 %s3631_s21, 4  ;;  %p3538_p0 = scmp.ne.s32.totalorder %s3924_s4, %s3537_s25  ;;  %s43_s22 = int_to_ptr.vmem [resolvable:$true] %s42_s22 }
   0x4   :  { %p3541_p1 = scmp.lt.u32.totalorder %s3537_s25, %s3924_s4 }
   0x6   :  { %p3543_p2 = pnand %p3541_p1, %p3538_p0 }
   0x8   :  { %3546 = shalt.err (!%p3543_p2)
}
   0x9   :  { %s3547_s30 = scalar_lea.vmem %s43_s22, 8192  ;;  %p3552_p4 = scmp.lt.s32.totalorder %s43_s22, %s43_s22 }
   0xa   :  { %p3548_p3 = scmp.ne.s32.totalorder %s43_s22, %s3547_s30  ;;  %p3553_p5 = scmp.lt.s32.totalorder %s3547_s30, %s3547_s30 }
   0xc   :  { %p3554_p6 = por %p3553_p5, %p3552_p4 }
   0xe   :  { %p3555_p7 = pnand %p3554_p6, %p3548_p3 }
  0x10   :  { %3558 = shalt.err (!%p3555_p7)
}
  0x11   :  { %s3632_s13 = smov 128   ;;  %s3633_s14 = smov 8  }
  0x12   :  { %48 = dma.hbm_to_vmem [thread:$0]  %s3924_s4, 8192, %s43_s22, [#allocation8], %s3632_s13, %s3632_s13, %s3633_s14  }
  0x13   :  { %s3634_s17 = smov [#allocation4]   ;;  %s3559_s21 = scalar_lea.hbm %s3922_s2, 25088 }
  0x14   :  { %s28_s18 = sshll.u32 %s3634_s17, 4  ;;  %p3560_p8 = scmp.ne.s32.totalorder %s3922_s2, %s3559_s21  ;;  %s29_s18 = int_to_ptr.vmem [resolvable:$true] %s28_s18 }
  0x15   :  { %p3563_p9 = scmp.lt.u32.totalorder %s3559_s21, %s3922_s2 }
  0x17   :  { %p3565_p10 = pnand %p3563_p9, %p3560_p8 }
  0x19   :  { %3568 = shalt.err (!%p3565_p10)
}
  0x1a   :  { %s3569_s27 = scalar_lea.vmem %s29_s18, 25088  ;;  %p3574_p12 = scmp.lt.s32.totalorder %s29_s18, %s29_s18 }
  0x1b   :  { %p3570_p11 = scmp.ne.s32.totalorder %s29_s18, %s3569_s27  ;;  %p3575_p13 = scmp.lt.s32.totalorder %s3569_s27, %s3569_s27 }
  0x1d   :  { %p3576_p0 = por %p3575_p13, %p3574_p12 }
  0x1f   :  { %p3577_p1 = pnand %p3576_p0, %p3570_p11 }
  0x21   :  { %3580 = shalt.err (!%p3577_p1)
}
  0x22   :  { %s3635_s4 = smov 256   ;;  %s3636_s22 = smov 16  }
  0x23   :  { %34 = dma.hbm_to_vmem [thread:$0]  %s3922_s2, 25088, %s29_s18, [#allocation5], %s3635_s4, %s3635_s4, %s3636_s22  }
  0x24   :  { %s3637_s30 = smov [#allocation9]   ;;  %s3581_s16 = scalar_lea.hbm %s3926_s6, 2048 }
  0x25   :  { %s56_s13 = sshll.u32 %s3637_s30, 4  ;;  %p3582_p2 = scmp.ne.s32.totalorder %s3926_s6, %s3581_s16  ;;  %s57_s13 = int_to_ptr.vmem [resolvable:$true] %s56_s13 }
  0x26   :  { %p3585_p3 = scmp.lt.u32.totalorder %s3581_s16, %s3926_s6 }
  0x28   :  { %p3587_p4 = pnand %p3585_p3, %p3582_p2 }
  0x2a   :  { %3590 = shalt.err (!%p3587_p4)
}
  0x2b   :  { %s3591_s23 = scalar_lea.vmem %s57_s13, 2048  ;;  %p3596_p6 = scmp.lt.s32.totalorder %s57_s13, %s57_s13 }
  0x2c   :  { %p3592_p5 = scmp.ne.s32.totalorder %s57_s13, %s3591_s23  ;;  %p3597_p7 = scmp.lt.s32.totalorder %s3591_s23, %s3591_s23 }
  0x2e   :  { %p3598_p8 = por %p3597_p7, %p3596_p6 }
  0x30   :  { %p3599_p9 = pnand %p3598_p8, %p3592_p5 }
  0x32   :  { %3602 = shalt.err (!%p3599_p9)
}
  0x33   :  { %s3638_s2 = smov 64   ;;  %s3639_s18 = smov 4  }
  0x34   :  { %62 = dma.hbm_to_vmem [thread:$0]  %s3926_s6, 2048, %s57_s13, [#allocation8], %s3638_s2, %s3638_s2, %s3639_s18  }
  0x35   :  { %3625 = dma.done.wait [#allocation5], 25088  }
  0x36   :  { %3626 = vsyncadd [#allocation5], 4294942208 }
  0x37   :  { %3627 = dma.done.wait [#allocation8], 10240  }
  0x38   :  { %3628 = vsyncadd [#allocation8], 4294957056  ;;  %v3640_v0 = vmov 0   ;;  %v3107_v1 = vld [vmem:[#allocation4 + $0x4] ss:$16 sps:$4 sm:$0xff]   ;;  %vm1311_vm0 = vcmask 130048  }
  0x39   :  { %1470 = vmatprep.mubr.bf16.mxu1 %v3640_v0  ;;  %v3109_v2 = vld [vmem:[#allocation4 + $0x604] ss:$16 sps:$4 sm:$0xff]   ;;  %1315 = vmatprep.subr.bf16.mxu0 %v3107_v1  ;;  %v3111_v3 = vld [vmem:[#allocation4] ss:$16 sps:$4 sm:$0xff]   ;;  %v3115_v6 = vld [vmem:[#allocation4 + $0x8] ss:$16 sps:$4 sm:$0xff]  }
  0x3a   :  { %v3112_v4 = vld [vmem:[#allocation4 + $0x600] ss:$16 sps:$4 sm:$0xff]   ;;  %1438 = vmatprep.subr.bf16.mxu1 %v3109_v2  ;;  %v3113_v5 = vld [vmem:[#allocation4 + $0x24] ss:$16 sps:$4 sm:$0xff]   ;;  %1316 = vmatpush1.bf16.msra.mxu0 %v3111_v3  ;;  %v3117_v7 = vld [vmem:[#allocation4 + $0xc] ss:$16 sps:$4 sm:$0xff]  }
  0x3b   :  { %1439 = vmatpush1.bf16.msra.mxu1 %v3112_v4  ;;  %1317 = vmatprep.subr.bf16.mxu0 %v3113_v5  ;;  %v3118_v8 = vld [vmem:[#allocation4 + $0x20] ss:$16 sps:$4 sm:$0xff]   ;;  %v3119_v9 = vld [vmem:[%s3921_s1 + $0x18] ss:$0 sps:$4 sm:$0xff]   ;;  %v3120_v10 = vld [vmem:[#allocation4 + $0x44] ss:$16 sps:$4 sm:$0xff]  }
  0x3c   :  { %1479 = vmatprep.subr.bf16.mxu1 %v3117_v7  ;;  %v3122_v11 = vld [vmem:[#allocation4 + $0x28] ss:$16 sps:$4 sm:$0xff]   ;;  %v3124_v12 = vld [vmem:[#allocation4 + $0x2c] ss:$16 sps:$4 sm:$0xff]   ;;  %v3125_v13 = vld [vmem:[#allocation4 + $0x40] ss:$16 sps:$4 sm:$0xff]  }
  0x3d   :  { %v3126_v14 = vld [vmem:[#allocation4 + $0x64] ss:$16 sps:$4 sm:$0xff]   ;;  %v3130_v15 = vld [vmem:[#allocation4 + $0x4c] ss:$16 sps:$4 sm:$0xff]   ;;  %v3128_v16 = vld [vmem:[#allocation4 + $0x48] ss:$16 sps:$4 sm:$0xff]  }
  0x3e   :  { %2875 = vmatmul.mubr.msk.bf16.vlgmr.msra.gmra.mrb[0].mxu1 %vm1311_vm0, %v3119_v9  ;;  %1318 = vmatpush1.bf16.msra.mxu0 %v3118_v8  ;;  %v3131_v17 = vld [vmem:[#allocation4 + $0x60] ss:$16 sps:$4 sm:$0xff]   ;;  %v3132_v18 = vld [vmem:[#allocation4 + $0x84] ss:$16 sps:$4 sm:$0xff]   ;;  %v3136_v19 = vld [vmem:[#allocation4 + $0x6c] ss:$16 sps:$4 sm:$0xff]  }
  0x3f   :  { %1480 = vmatpush1.bf16.msra.mxu1 %v3115_v6  ;;  %1319 = vmatprep.subr.bf16.mxu0 %v3120_v10  ;;  %v3134_v20 = vld [vmem:[#allocation4 + $0x68] ss:$16 sps:$4 sm:$0xff]   ;;  %v3137_v21 = vld [vmem:[#allocation4 + $0x80] ss:$16 sps:$4 sm:$0xff]   ;;  %v3138_v22 = vld [vmem:[#allocation4 + $0xa4] ss:$16 sps:$4 sm:$0xff]  }
  0x40   :  { %1481 = vmatprep.subr.bf16.mxu1 %v3124_v12  ;;  %v3142_v23 = vld [vmem:[#allocation4 + $0x8c] ss:$16 sps:$4 sm:$0xff]   ;;  %v3140_v24 = vld [vmem:[#allocation4 + $0x88] ss:$16 sps:$4 sm:$0xff]   ;;  %v3143_v25 = vld [vmem:[#allocation4 + $0xa0] ss:$16 sps:$4 sm:$0xff]  }
  0x41   :  { %v3144_v26 = vld [vmem:[#allocation4 + $0xc4] ss:$16 sps:$4 sm:$0xff]   ;;  %v3148_v27 = vld [vmem:[#allocation4 + $0xac] ss:$16 sps:$4 sm:$0xff]   ;;  %v3146_v28 = vld [vmem:[#allocation4 + $0xa8] ss:$16 sps:$4 sm:$0xff]  }
  0x42   :  { %1320 = vmatpush1.bf16.msra.mxu0 %v3125_v13  ;;  %v3149_v29 = vld [vmem:[#allocation4 + $0xc0] ss:$16 sps:$4 sm:$0xff]   ;;  %v3150_v30 = vld [vmem:[#allocation4 + $0xe4] ss:$16 sps:$4 sm:$0xff]   ;;  %v3154_v31 = vld [vmem:[#allocation4 + $0xcc] ss:$16 sps:$4 sm:$0xff]  }
  0x43   :  { %1482 = vmatpush1.bf16.msra.mxu1 %v3122_v11  ;;  %1321 = vmatprep.subr.bf16.mxu0 %v3126_v14  ;;  %v3152_v32 = vld [vmem:[#allocation4 + $0xc8] ss:$16 sps:$4 sm:$0xff]   ;;  %v3155_v33 = vld [vmem:[#allocation4 + $0xe0] ss:$16 sps:$4 sm:$0xff]   ;;  %v3156_v34 = vld [vmem:[#allocation4 + $0x104] ss:$16 sps:$4 sm:$0xff]  }
  0x44   :  { %1483 = vmatprep.subr.bf16.mxu1 %v3130_v15  ;;  %v3160_v35 = vld [vmem:[#allocation4 + $0xec] ss:$16 sps:$4 sm:$0xff]   ;;  %v3158_v36 = vld [vmem:[#allocation4 + $0xe8] ss:$16 sps:$4 sm:$0xff]   ;;  %v3161_v37 = vld [vmem:[#allocation4 + $0x100] ss:$16 sps:$4 sm:$0xff]  }
  0x45   :  { %v3162_v38 = vld [vmem:[#allocation4 + $0x124] ss:$16 sps:$4 sm:$0xff]   ;;  %v3166_v39 = vld [vmem:[#allocation4 + $0x10c] ss:$16 sps:$4 sm:$0xff]   ;;  %v3164_v40 = vld [vmem:[#allocation4 + $0x108] ss:$16 sps:$4 sm:$0xff]  }
  0x46   :  { %1322 = vmatpush1.bf16.msra.mxu0 %v3131_v17  ;;  %v3167_v41 = vld [vmem:[#allocation4 + $0x120] ss:$16 sps:$4 sm:$0xff]   ;;  %v3168_v42 = vld [vmem:[#allocation4 + $0x144] ss:$16 sps:$4 sm:$0xff]   ;;  %v3172_v43 = vld [vmem:[#allocation4 + $0x12c] ss:$16 sps:$4 sm:$0xff]  }
  0x47   :  { %1484 = vmatpush1.bf16.msra.mxu1 %v3128_v16  ;;  %1323 = vmatprep.subr.bf16.mxu0 %v3132_v18  ;;  %v3170_v44 = vld [vmem:[#allocation4 + $0x128] ss:$16 sps:$4 sm:$0xff]   ;;  %v3173_v45 = vld [vmem:[#allocation4 + $0x140] ss:$16 sps:$4 sm:$0xff]   ;;  %v3174_v46 = vld [vmem:[#allocation4 + $0x164] ss:$16 sps:$4 sm:$0xff]  }
  0x48   :  { %1485 = vmatprep.subr.bf16.mxu1 %v3136_v19  ;;  %v3178_v47 = vld [vmem:[#allocation4 + $0x14c] ss:$16 sps:$4 sm:$0xff]   ;;  %v3176_v48 = vld [vmem:[#allocation4 + $0x148] ss:$16 sps:$4 sm:$0xff]   ;;  %v85_v49 = vld [vmem:[%s3921_s1] sm:$0xff] }
  0x49   :  { %v3179_v50 = vld [vmem:[#allocation4 + $0x160] ss:$16 sps:$4 sm:$0xff]   ;;  %v3180_v51 = vld [vmem:[#allocation4 + $0x184] ss:$16 sps:$4 sm:$0xff]   ;;  %v2673_v52 = vcombine.high %v85_v49, %v85_v49  ;;  %v3184_v53 = vld [vmem:[#allocation4 + $0x16c] ss:$16 sps:$4 sm:$0xff]   ;;  %v2672_v7 = vcombine.low %v85_v49, %v85_v49 }
  0x4a   :  { %1324 = vmatpush1.bf16.msra.mxu0 %v3137_v21  ;;  %v3182_v54 = vld [vmem:[#allocation4 + $0x168] ss:$16 sps:$4 sm:$0xff]   ;;  %v3185_v55 = vld [vmem:[#allocation4 + $0x180] ss:$16 sps:$4 sm:$0xff]   ;;  %v3186_v56 = vld [vmem:[#allocation4 + $0x1a4] ss:$16 sps:$4 sm:$0xff]  }
  0x4b   :  { %1486 = vmatpush1.bf16.msra.mxu1 %v3134_v20  ;;  %1325 = vmatprep.subr.bf16.mxu0 %v3138_v22  ;;  %v3190_v57 = vld [vmem:[#allocation4 + $0x18c] ss:$16 sps:$4 sm:$0xff]   ;;  %v3188_v58 = vld [vmem:[#allocation4 + $0x188] ss:$16 sps:$4 sm:$0xff]   ;;  %v3191_v59 = vld [vmem:[#allocation4 + $0x1a0] ss:$16 sps:$4 sm:$0xff]  }
  0x4c   :  { %1487 = vmatprep.subr.bf16.mxu1 %v3142_v23  ;;  %1347 = vmatprep.mubr.bf16.mxu0 %v2673_v52  ;;  %v3192_v60 = vld [vmem:[#allocation4 + $0x1c4] ss:$16 sps:$4 sm:$0xff]   ;;  %v3196_v61 = vld [vmem:[#allocation4 + $0x1ac] ss:$16 sps:$4 sm:$0xff]   ;;  %v3194_v62 = vld [vmem:[#allocation4 + $0x1a8] ss:$16 sps:$4 sm:$0xff]  }
  0x4d   :  { %1511 = vmatprep.mubr.bf16.mxu1 %v2673_v52  ;;  %v3197_v63 = vld [vmem:[#allocation4 + $0x1c0] ss:$16 sps:$4 sm:$0xff]   ;;  %v3198_v1 = vld [vmem:[#allocation4 + $0x1e4] ss:$16 sps:$4 sm:$0xff]   ;;  %v3202_v2 = vld [vmem:[#allocation4 + $0x1cc] ss:$16 sps:$4 sm:$0xff]  }
  0x4e   :  { %1326 = vmatpush1.bf16.msra.mxu0 %v3143_v25  ;;  %v3200_v3 = vld [vmem:[#allocation4 + $0x1c8] ss:$16 sps:$4 sm:$0xff]   ;;  %v3203_v4 = vld [vmem:[#allocation4 + $0x1e0] ss:$16 sps:$4 sm:$0xff]   ;;  %v3208_v5 = vld [vmem:[#allocation4 + $0x204] ss:$16 sps:$4 sm:$0xff]  }
  0x4f   :  { %1488 = vmatpush1.bf16.msra.mxu1 %v3140_v24  ;;  %1327 = vmatprep.subr.bf16.mxu0 %v3144_v26  ;;  %v3211_v6 = vld [vmem:[#allocation4 + $0x1ec] ss:$16 sps:$4 sm:$0xff]   ;;  %v3206_v8 = vld [vmem:[#allocation4 + $0x200] ss:$16 sps:$4 sm:$0xff]   ;;  %v3209_v9 = vld [vmem:[#allocation4 + $0x1e8] ss:$16 sps:$4 sm:$0xff]  }
  0x50   :  { %1489 = vmatprep.subr.bf16.mxu1 %v3148_v27  ;;  %v3214_v10 = vld [vmem:[#allocation4 + $0x224] ss:$16 sps:$4 sm:$0xff]   ;;  %v3217_v11 = vld [vmem:[#allocation4 + $0x20c] ss:$16 sps:$4 sm:$0xff]   ;;  %v3212_v12 = vld [vmem:[#allocation4 + $0x220] ss:$16 sps:$4 sm:$0xff]  }
  0x51   :  { %v3215_v13 = vld [vmem:[#allocation4 + $0x208] ss:$16 sps:$4 sm:$0xff]   ;;  %v3220_v14 = vld [vmem:[#allocation4 + $0x244] ss:$16 sps:$4 sm:$0xff]   ;;  %v3223_v15 = vld [vmem:[#allocation4 + $0x22c] ss:$16 sps:$4 sm:$0xff]  }
  0x52   :  { %1328 = vmatpush1.bf16.msra.mxu0 %v3149_v29  ;;  %v3218_v16 = vld [vmem:[#allocation4 + $0x240] ss:$16 sps:$4 sm:$0xff]   ;;  %v3221_v17 = vld [vmem:[#allocation4 + $0x228] ss:$16 sps:$4 sm:$0xff]   ;;  %v3226_v18 = vld [vmem:[#allocation4 + $0x264] ss:$16 sps:$4 sm:$0xff]  }
  0x53   :  { %1490 = vmatpush1.bf16.msra.mxu1 %v3146_v28  ;;  %1329 = vmatprep.subr.bf16.mxu0 %v3150_v30  ;;  %v3229_v19 = vld [vmem:[#allocation4 + $0x24c] ss:$16 sps:$4 sm:$0xff]   ;;  %v3224_v20 = vld [vmem:[#allocation4 + $0x260] ss:$16 sps:$4 sm:$0xff]   ;;  %v3227_v21 = vld [vmem:[#allocation4 + $0x248] ss:$16 sps:$4 sm:$0xff]  }
  0x54   :  { %1491 = vmatprep.subr.bf16.mxu1 %v3154_v31  ;;  %v3232_v22 = vld [vmem:[#allocation4 + $0x284] ss:$16 sps:$4 sm:$0xff]   ;;  %v3235_v23 = vld [vmem:[#allocation4 + $0x26c] ss:$16 sps:$4 sm:$0xff]   ;;  %v3230_v24 = vld [vmem:[#allocation4 + $0x280] ss:$16 sps:$4 sm:$0xff]  }
  0x55   :  { %v3233_v25 = vld [vmem:[#allocation4 + $0x268] ss:$16 sps:$4 sm:$0xff]   ;;  %v3238_v26 = vld [vmem:[#allocation4 + $0x2a4] ss:$16 sps:$4 sm:$0xff]   ;;  %v3241_v27 = vld [vmem:[#allocation4 + $0x28c] ss:$16 sps:$4 sm:$0xff]  }
  0x56   :  { %1330 = vmatpush1.bf16.msra.mxu0 %v3155_v33  ;;  %v3236_v28 = vld [vmem:[#allocation4 + $0x2a0] ss:$16 sps:$4 sm:$0xff]   ;;  %v3239_v29 = vld [vmem:[#allocation4 + $0x288] ss:$16 sps:$4 sm:$0xff]   ;;  %v3244_v30 = vld [vmem:[#allocation4 + $0x2c4] ss:$16 sps:$4 sm:$0xff]  }
  0x57   :  { %1492 = vmatpush1.bf16.msra.mxu1 %v3152_v32  ;;  %1331 = vmatprep.subr.bf16.mxu0 %v3156_v34  ;;  %v3247_v31 = vld [vmem:[#allocation4 + $0x2ac] ss:$16 sps:$4 sm:$0xff]   ;;  %v3242_v33 = vld [vmem:[#allocation4 + $0x2c0] ss:$16 sps:$4 sm:$0xff]   ;;  %v3245_v34 = vld [vmem:[#allocation4 + $0x2a8] ss:$16 sps:$4 sm:$0xff]  }
  0x58   :  { %1493 = vmatprep.subr.bf16.mxu1 %v3160_v35  ;;  %v3756_v32 = vld [vmem:[%s3921_s1 + $0x8] sm:$0xff]  ;;  %v3274_v52 = vld [vmem:[#allocation4 + $0x364] ss:$16 sps:$4 sm:$0xff]  }
  0x59   :  { %v2675_v35 = vcombine.high %v3756_v32, %v3756_v32  ;;  %v3271_v49 = vld [vmem:[#allocation4 + $0x32c] ss:$16 sps:$4 sm:$0xff]  }
  0x5a   :  { %1332 = vmatpush1.bf16.msra.mxu0 %v3161_v37  ;;  %v3253_v37 = vld [vmem:[#allocation4 + $0x2cc] ss:$16 sps:$4 sm:$0xff]  }
  0x5b   :  { %1494 = vmatpush1.bf16.msra.mxu1 %v3158_v36  ;;  %1333 = vmatprep.subr.bf16.mxu0 %v3162_v38  ;;  %v3250_v36 = vld [vmem:[#allocation4 + $0x2e4] ss:$16 sps:$4 sm:$0xff]   ;;  %v3248_v38 = vld [vmem:[#allocation4 + $0x2e0] ss:$16 sps:$4 sm:$0xff]  }
  0x5c   :  { %1495 = vmatprep.subr.bf16.mxu1 %v3166_v39  ;;  %v3251_v39 = vld [vmem:[#allocation4 + $0x2c8] ss:$16 sps:$4 sm:$0xff]  }
  0x5e   :  { %1334 = vmatpush1.bf16.msra.mxu0 %v3167_v41  ;;  %v3259_v41 = vld [vmem:[#allocation4 + $0x2ec] ss:$16 sps:$4 sm:$0xff]  }
  0x5f   :  { %1496 = vmatpush1.bf16.msra.mxu1 %v3164_v40  ;;  %1335 = vmatprep.subr.bf16.mxu0 %v3168_v42  ;;  %v3256_v40 = vld [vmem:[#allocation4 + $0x304] ss:$16 sps:$4 sm:$0xff]   ;;  %v3254_v42 = vld [vmem:[#allocation4 + $0x300] ss:$16 sps:$4 sm:$0xff]  }
  0x60   :  { %1497 = vmatprep.subr.bf16.mxu1 %v3172_v43  ;;  %v3257_v43 = vld [vmem:[#allocation4 + $0x2e8] ss:$16 sps:$4 sm:$0xff]  }
  0x62   :  { %1336 = vmatpush1.bf16.msra.mxu0 %v3173_v45  ;;  %v3265_v45 = vld [vmem:[#allocation4 + $0x30c] ss:$16 sps:$4 sm:$0xff]  }
  0x63   :  { %1498 = vmatpush1.bf16.msra.mxu1 %v3170_v44  ;;  %1337 = vmatprep.subr.bf16.mxu0 %v3174_v46  ;;  %v3262_v44 = vld [vmem:[#allocation4 + $0x324] ss:$16 sps:$4 sm:$0xff]   ;;  %v3260_v46 = vld [vmem:[#allocation4 + $0x320] ss:$16 sps:$4 sm:$0xff]  }
  0x64   :  { %1499 = vmatprep.subr.bf16.mxu1 %v3178_v47  ;;  %v3263_v47 = vld [vmem:[#allocation4 + $0x308] ss:$16 sps:$4 sm:$0xff]  }
  0x66   :  { %1338 = vmatpush1.bf16.msra.mxu0 %v3179_v50  ;;  %v3266_v50 = vld [vmem:[#allocation4 + $0x340] ss:$16 sps:$4 sm:$0xff]  }
  0x67   :  { %1500 = vmatpush1.bf16.msra.mxu1 %v3176_v48  ;;  %1339 = vmatprep.subr.bf16.mxu0 %v3180_v51  ;;  %v3268_v48 = vld [vmem:[#allocation4 + $0x344] ss:$16 sps:$4 sm:$0xff]   ;;  %v3269_v51 = vld [vmem:[#allocation4 + $0x328] ss:$16 sps:$4 sm:$0xff]  }
  0x68   :  { %1501 = vmatprep.subr.bf16.mxu1 %v3184_v53  ;;  %v3277_v53 = vld [vmem:[#allocation4 + $0x34c] ss:$16 sps:$4 sm:$0xff]  }
  0x6a   :  { %1340 = vmatpush1.bf16.msra.mxu0 %v3185_v55  ;;  %v3275_v55 = vld [vmem:[#allocation4 + $0x348] ss:$16 sps:$4 sm:$0xff]  }
  0x6b   :  { %1502 = vmatpush1.bf16.msra.mxu1 %v3182_v54  ;;  %1341 = vmatprep.subr.bf16.mxu0 %v3186_v56  ;;  %v3272_v54 = vld [vmem:[#allocation4 + $0x360] ss:$16 sps:$4 sm:$0xff]   ;;  %v3280_v56 = vld [vmem:[#allocation4 + $0x384] ss:$16 sps:$4 sm:$0xff]  }
  0x6c   :  { %1503 = vmatprep.subr.bf16.mxu1 %v3190_v57  ;;  %v3283_v57 = vld [vmem:[#allocation4 + $0x36c] ss:$16 sps:$4 sm:$0xff]  }
  0x6e   :  { %1342 = vmatpush1.bf16.msra.mxu0 %v3191_v59  ;;  %v3281_v59 = vld [vmem:[#allocation4 + $0x368] ss:$16 sps:$4 sm:$0xff]  }
  0x6f   :  { %1504 = vmatpush1.bf16.msra.mxu1 %v3188_v58  ;;  %1343 = vmatprep.subr.bf16.mxu0 %v3192_v60  ;;  %v3278_v58 = vld [vmem:[#allocation4 + $0x380] ss:$16 sps:$4 sm:$0xff]   ;;  %v3286_v60 = vld [vmem:[#allocation4 + $0x3a4] ss:$16 sps:$4 sm:$0xff]  }
  0x70   :  { %1505 = vmatprep.subr.bf16.mxu1 %v3196_v61  ;;  %v3289_v61 = vld [vmem:[#allocation4 + $0x38c] ss:$16 sps:$4 sm:$0xff]  }
  0x72   :  { %1344 = vmatpush1.bf16.msra.mxu0 %v3197_v63  ;;  %v3287_v63 = vld [vmem:[#allocation4 + $0x388] ss:$16 sps:$4 sm:$0xff]  }
  0x73   :  { %1506 = vmatpush1.bf16.msra.mxu1 %v3194_v62  ;;  %1345 = vmatprep.subr.bf16.mxu0 %v3198_v1  ;;  %v3284_v62 = vld [vmem:[#allocation4 + $0x3a0] ss:$16 sps:$4 sm:$0xff]   ;;  %v3292_v1 = vld [vmem:[#allocation4 + $0x3c4] ss:$16 sps:$4 sm:$0xff]  }
  0x74   :  { %1507 = vmatprep.subr.bf16.mxu1 %v3202_v2  ;;  %v3295_v2 = vld [vmem:[#allocation4 + $0x3ac] ss:$16 sps:$4 sm:$0xff]  }
  0x76   :  { %1346 = vmatpush1.bf16.msra.mxu0 %v3203_v4  ;;  %v3293_v4 = vld [vmem:[#allocation4 + $0x3a8] ss:$16 sps:$4 sm:$0xff]  }
  0x77   :  { %1508 = vmatpush1.bf16.msra.mxu1 %v3200_v3  ;;  %1356 = vmatprep.subr.bf16.mxu0 %v3208_v5  ;;  %v3290_v3 = vld [vmem:[#allocation4 + $0x3c0] ss:$16 sps:$4 sm:$0xff]   ;;  %v3298_v5 = vld [vmem:[#allocation4 + $0x3e4] ss:$16 sps:$4 sm:$0xff]  }
  0x78   :  { %1509 = vmatprep.subr.bf16.mxu1 %v3211_v6  ;;  %v3301_v6 = vld [vmem:[#allocation4 + $0x3cc] ss:$16 sps:$4 sm:$0xff]  }
  0x79   :  { %1348 = vmatmul.mubr.bf16.vlgmr.msra.gmra.mrb[0].mxu0 %v2672_v7 }
  0x7a   :  { %1357 = vmatpush1.bf16.msra.mxu0 %v3206_v8  ;;  %1388 = vmatprep.mubr.bf16.mxu0 %v2675_v35  ;;  %v3299_v8 = vld [vmem:[#allocation4 + $0x3c8] ss:$16 sps:$4 sm:$0xff]  }
  0x7b   :  { %1510 = vmatpush1.bf16.msra.mxu1 %v3209_v9  ;;  %1358 = vmatprep.subr.bf16.mxu0 %v3214_v10  ;;  %v3306_v9 = vld [vmem:[#allocation4 + $0x404] ss:$16 sps:$4 sm:$0xff]   ;;  %v3309_v10 = vld [vmem:[#allocation4 + $0x3ec] ss:$16 sps:$4 sm:$0xff]  }
  0x7c   :  { %1520 = vmatprep.subr.bf16.mxu1 %v3217_v11  ;;  %v2674_v11 = vcombine.low %v3756_v32, %v3756_v32  ;;  %v3336_v32 = vld [vmem:[#allocation4 + $0x4a4] ss:$16 sps:$4 sm:$0xff]  }
  0x7e   :  { %1512 = vmatmul.mubr.bf16.vlgmr.msra.gmra.mrb[4].mxu1 %v2672_v7  ;;  %1359 = vmatpush1.bf16.msra.mxu0 %v3212_v12  ;;  %v3296_v7 = vld [vmem:[#allocation4 + $0x3e0] ss:$16 sps:$4 sm:$0xff]  }
  0x7f   :  { %1521 = vmatpush1.bf16.msra.mxu1 %v3215_v13  ;;  %1360 = vmatprep.subr.bf16.mxu0 %v3220_v14  ;;  %v3304_v12 = vld [vmem:[#allocation4 + $0x400] ss:$16 sps:$4 sm:$0xff]   ;;  %v3307_v13 = vld [vmem:[#allocation4 + $0x3e8] ss:$16 sps:$4 sm:$0xff]   ;;  %v3312_v14 = vld [vmem:[#allocation4 + $0x424] ss:$16 sps:$4 sm:$0xff]  }
  0x80   :  { %1522 = vmatprep.subr.bf16.mxu1 %v3223_v15  ;;  %1552 = vmatprep.mubr.bf16.mxu1 %v2675_v35  ;;  %v3315_v15 = vld [vmem:[#allocation4 + $0x40c] ss:$16 sps:$4 sm:$0xff]   ;;  %v3337_v35 = vld [vmem:[#allocation4 + $0x488] ss:$16 sps:$4 sm:$0xff]  }
  0x82   :  { %1361 = vmatpush1.bf16.msra.mxu0 %v3218_v16  ;;  %v3765_v16 = vld [vmem:[%s3921_s1 + $0x10] sm:$0xff] }
  0x83   :  { %1523 = vmatpush1.bf16.msra.mxu1 %v3221_v17  ;;  %1362 = vmatprep.subr.bf16.mxu0 %v3226_v18  ;;  %v2677_v17 = vcombine.high %v3765_v16, %v3765_v16  ;;  %v3310_v18 = vld [vmem:[#allocation4 + $0x420] ss:$16 sps:$4 sm:$0xff]  }
  0x84   :  { %1524 = vmatprep.subr.bf16.mxu1 %v3229_v19  ;;  %v3313_v19 = vld [vmem:[#allocation4 + $0x408] ss:$16 sps:$4 sm:$0xff]  }
  0x86   :  { %1363 = vmatpush1.bf16.msra.mxu0 %v3224_v20  ;;  %v3318_v20 = vld [vmem:[#allocation4 + $0x444] ss:$16 sps:$4 sm:$0xff]  }
  0x87   :  { %1525 = vmatpush1.bf16.msra.mxu1 %v3227_v21  ;;  %1364 = vmatprep.subr.bf16.mxu0 %v3232_v22  ;;  %v3321_v21 = vld [vmem:[#allocation4 + $0x42c] ss:$16 sps:$4 sm:$0xff]   ;;  %v3316_v22 = vld [vmem:[#allocation4 + $0x440] ss:$16 sps:$4 sm:$0xff]  }
  0x88   :  { %1526 = vmatprep.subr.bf16.mxu1 %v3235_v23  ;;  %v3319_v23 = vld [vmem:[#allocation4 + $0x428] ss:$16 sps:$4 sm:$0xff]  }
  0x8a   :  { %1365 = vmatpush1.bf16.msra.mxu0 %v3230_v24  ;;  %v3324_v24 = vld [vmem:[#allocation4 + $0x464] ss:$16 sps:$4 sm:$0xff]  }
  0x8b   :  { %1527 = vmatpush1.bf16.msra.mxu1 %v3233_v25  ;;  %1366 = vmatprep.subr.bf16.mxu0 %v3238_v26  ;;  %v3327_v25 = vld [vmem:[#allocation4 + $0x44c] ss:$16 sps:$4 sm:$0xff]   ;;  %v3322_v26 = vld [vmem:[#allocation4 + $0x460] ss:$16 sps:$4 sm:$0xff]  }
  0x8c   :  { %1528 = vmatprep.subr.bf16.mxu1 %v3241_v27  ;;  %v3325_v27 = vld [vmem:[#allocation4 + $0x448] ss:$16 sps:$4 sm:$0xff]  }
  0x8e   :  { %1367 = vmatpush1.bf16.msra.mxu0 %v3236_v28  ;;  %v3330_v28 = vld [vmem:[#allocation4 + $0x484] ss:$16 sps:$4 sm:$0xff]  }
  0x8f   :  { %1529 = vmatpush1.bf16.msra.mxu1 %v3239_v29  ;;  %1368 = vmatprep.subr.bf16.mxu0 %v3244_v30  ;;  %v3333_v29 = vld [vmem:[#allocation4 + $0x46c] ss:$16 sps:$4 sm:$0xff]   ;;  %v3328_v30 = vld [vmem:[#allocation4 + $0x480] ss:$16 sps:$4 sm:$0xff]  }
  0x90   :  { %1530 = vmatprep.subr.bf16.mxu1 %v3247_v31  ;;  %v3331_v31 = vld [vmem:[#allocation4 + $0x468] ss:$16 sps:$4 sm:$0xff]  }
  0x92   :  { %1369 = vmatpush1.bf16.msra.mxu0 %v3242_v33  ;;  %v3339_v33 = vld [vmem:[#allocation4 + $0x48c] ss:$16 sps:$4 sm:$0xff]  }
  0x93   :  { %1531 = vmatpush1.bf16.msra.mxu1 %v3245_v34  ;;  %1370 = vmatprep.subr.bf16.mxu0 %v3250_v36  ;;  %v3334_v34 = vld [vmem:[#allocation4 + $0x4a0] ss:$16 sps:$4 sm:$0xff]   ;;  %v3342_v36 = vld [vmem:[#allocation4 + $0x4c4] ss:$16 sps:$4 sm:$0xff]  }
  0x94   :  { %1532 = vmatprep.subr.bf16.mxu1 %v3253_v37  ;;  %v3345_v37 = vld [vmem:[#allocation4 + $0x4ac] ss:$16 sps:$4 sm:$0xff]  }
  0x96   :  { %1371 = vmatpush1.bf16.msra.mxu0 %v3248_v38  ;;  %v3340_v38 = vld [vmem:[#allocation4 + $0x4c0] ss:$16 sps:$4 sm:$0xff]  }
  0x97   :  { %1533 = vmatpush1.bf16.msra.mxu1 %v3251_v39  ;;  %1372 = vmatprep.subr.bf16.mxu0 %v3256_v40  ;;  %v3343_v39 = vld [vmem:[#allocation4 + $0x4a8] ss:$16 sps:$4 sm:$0xff]   ;;  %v3348_v40 = vld [vmem:[#allocation4 + $0x4e4] ss:$16 sps:$4 sm:$0xff]  }
  0x98   :  { %1534 = vmatprep.subr.bf16.mxu1 %v3259_v41  ;;  %v3351_v41 = vld [vmem:[#allocation4 + $0x4cc] ss:$16 sps:$4 sm:$0xff]  }
  0x9a   :  { %1373 = vmatpush1.bf16.msra.mxu0 %v3254_v42  ;;  %v3346_v42 = vld [vmem:[#allocation4 + $0x4e0] ss:$16 sps:$4 sm:$0xff]  }
  0x9b   :  { %1535 = vmatpush1.bf16.msra.mxu1 %v3257_v43  ;;  %1374 = vmatprep.subr.bf16.mxu0 %v3262_v44  ;;  %v3349_v43 = vld [vmem:[#allocation4 + $0x4c8] ss:$16 sps:$4 sm:$0xff]   ;;  %v3354_v44 = vld [vmem:[#allocation4 + $0x504] ss:$16 sps:$4 sm:$0xff]  }
  0x9c   :  { %1536 = vmatprep.subr.bf16.mxu1 %v3265_v45  ;;  %v3357_v45 = vld [vmem:[#allocation4 + $0x4ec] ss:$16 sps:$4 sm:$0xff]  }
  0x9e   :  { %1375 = vmatpush1.bf16.msra.mxu0 %v3260_v46  ;;  %v3352_v46 = vld [vmem:[#allocation4 + $0x500] ss:$16 sps:$4 sm:$0xff]  }
  0x9f   :  { %1537 = vmatpush1.bf16.msra.mxu1 %v3263_v47  ;;  %1376 = vmatprep.subr.bf16.mxu0 %v3268_v48  ;;  %v3355_v47 = vld [vmem:[#allocation4 + $0x4e8] ss:$16 sps:$4 sm:$0xff]   ;;  %v3360_v48 = vld [vmem:[#allocation4 + $0x524] ss:$16 sps:$4 sm:$0xff]  }
  0xa0   :  { %1538 = vmatprep.subr.bf16.mxu1 %v3271_v49  ;;  %v3363_v49 = vld [vmem:[#allocation4 + $0x50c] ss:$16 sps:$4 sm:$0xff]  }
  0xa2   :  { %1377 = vmatpush1.bf16.msra.mxu0 %v3266_v50  ;;  %v3358_v50 = vld [vmem:[#allocation4 + $0x520] ss:$16 sps:$4 sm:$0xff]  }
  0xa3   :  { %1539 = vmatpush1.bf16.msra.mxu1 %v3269_v51  ;;  %1378 = vmatprep.subr.bf16.mxu0 %v3274_v52  ;;  %v3361_v51 = vld [vmem:[#allocation4 + $0x508] ss:$16 sps:$4 sm:$0xff]   ;;  %v3366_v52 = vld [vmem:[#allocation4 + $0x544] ss:$16 sps:$4 sm:$0xff]  }
  0xa4   :  { %1540 = vmatprep.subr.bf16.mxu1 %v3277_v53  ;;  %v3369_v53 = vld [vmem:[#allocation4 + $0x52c] ss:$16 sps:$4 sm:$0xff]  }
  0xa6   :  { %1379 = vmatpush1.bf16.msra.mxu0 %v3272_v54  ;;  %v3364_v54 = vld [vmem:[#allocation4 + $0x540] ss:$16 sps:$4 sm:$0xff]  }
  0xa7   :  { %1541 = vmatpush1.bf16.msra.mxu1 %v3275_v55  ;;  %1380 = vmatprep.subr.bf16.mxu0 %v3280_v56  ;;  %v3367_v55 = vld [vmem:[#allocation4 + $0x528] ss:$16 sps:$4 sm:$0xff]   ;;  %v3372_v56 = vld [vmem:[#allocation4 + $0x564] ss:$16 sps:$4 sm:$0xff]  }
  0xa8   :  { %1542 = vmatprep.subr.bf16.mxu1 %v3283_v57  ;;  %v3375_v57 = vld [vmem:[#allocation4 + $0x54c] ss:$16 sps:$4 sm:$0xff]  }
  0xaa   :  { %1381 = vmatpush1.bf16.msra.mxu0 %v3278_v58  ;;  %v3370_v58 = vld [vmem:[#allocation4 + $0x560] ss:$16 sps:$4 sm:$0xff]  }
  0xab   :  { %1543 = vmatpush1.bf16.msra.mxu1 %v3281_v59  ;;  %1382 = vmatprep.subr.bf16.mxu0 %v3286_v60  ;;  %v3373_v59 = vld [vmem:[#allocation4 + $0x548] ss:$16 sps:$4 sm:$0xff]   ;;  %v3378_v60 = vld [vmem:[#allocation4 + $0x584] ss:$16 sps:$4 sm:$0xff]  }
  0xac   :  { %1544 = vmatprep.subr.bf16.mxu1 %v3289_v61  ;;  %v3381_v61 = vld [vmem:[#allocation4 + $0x56c] ss:$16 sps:$4 sm:$0xff]  }
  0xae   :  { %1383 = vmatpush1.bf16.msra.mxu0 %v3284_v62  ;;  %v3376_v62 = vld [vmem:[#allocation4 + $0x580] ss:$16 sps:$4 sm:$0xff]  }
  0xaf   :  { %1545 = vmatpush1.bf16.msra.mxu1 %v3287_v63  ;;  %1384 = vmatprep.subr.bf16.mxu0 %v3292_v1  ;;  %v3379_v63 = vld [vmem:[#allocation4 + $0x568] ss:$16 sps:$4 sm:$0xff]   ;;  %v3384_v1 = vld [vmem:[#allocation4 + $0x5a4] ss:$16 sps:$4 sm:$0xff]  }
  0xb0   :  { %1546 = vmatprep.subr.bf16.mxu1 %v3295_v2  ;;  %v3387_v2 = vld [vmem:[#allocation4 + $0x58c] ss:$16 sps:$4 sm:$0xff]  }
  0xb2   :  { %1385 = vmatpush1.bf16.msra.mxu0 %v3290_v3  ;;  %v3382_v3 = vld [vmem:[#allocation4 + $0x5a0] ss:$16 sps:$4 sm:$0xff]  }
  0xb3   :  { %1547 = vmatpush1.bf16.msra.mxu1 %v3293_v4  ;;  %1386 = vmatprep.subr.bf16.mxu0 %v3298_v5  ;;  %v3385_v4 = vld [vmem:[#allocation4 + $0x588] ss:$16 sps:$4 sm:$0xff]   ;;  %v3390_v5 = vld [vmem:[#allocation4 + $0x5c4] ss:$16 sps:$4 sm:$0xff]  }
  0xb4   :  { %1548 = vmatprep.subr.bf16.mxu1 %v3301_v6  ;;  %v3393_v6 = vld [vmem:[#allocation4 + $0x5ac] ss:$16 sps:$4 sm:$0xff]  }
  0xb6   :  { %1387 = vmatpush1.bf16.msra.mxu0 %v3296_v7  ;;  %v3388_v7 = vld [vmem:[#allocation4 + $0x5c0] ss:$16 sps:$4 sm:$0xff]  }
  0xb7   :  { %1549 = vmatpush1.bf16.msra.mxu1 %v3299_v8  ;;  %1397 = vmatprep.subr.bf16.mxu0 %v3306_v9  ;;  %v3391_v8 = vld [vmem:[#allocation4 + $0x5a8] ss:$16 sps:$4 sm:$0xff]   ;;  %v3396_v9 = vld [vmem:[#allocation4 + $0x5e4] ss:$16 sps:$4 sm:$0xff]  }
  0xb8   :  { %1550 = vmatprep.subr.bf16.mxu1 %v3309_v10  ;;  %v3399_v10 = vld [vmem:[#allocation4 + $0x5cc] ss:$16 sps:$4 sm:$0xff]  }
  0xb9   :  { %1389 = vmatmul.mubr.bf16.vlgmr.msra.gmra.mrb[0].mxu0 %v2674_v11 }
  0xba   :  { %1398 = vmatpush1.bf16.msra.mxu0 %v3304_v12  ;;  %1429 = vmatprep.mubr.bf16.mxu0 %v2677_v17  ;;  %v3397_v12 = vld [vmem:[#allocation4 + $0x5c8] ss:$16 sps:$4 sm:$0xff]  }
  0xbb   :  { %1551 = vmatpush1.bf16.msra.mxu1 %v3307_v13  ;;  %1399 = vmatprep.subr.bf16.mxu0 %v3312_v14  ;;  %v3404_v13 = vld [vmem:[#allocation4 + $0x5ec] ss:$16 sps:$4 sm:$0xff]  }
  0xbc   :  { %1561 = vmatprep.subr.bf16.mxu1 %v3315_v15  ;;  %v3410_v14 = vld [vmem:[#allocation7 + $0x4] ss:$8 sps:$4 sm:$0xff]   ;;  %v2676_v15 = vcombine.low %v3765_v16, %v3765_v16  ;;  %v3414_v16 = vld [vmem:[#allocation7 + $0x20] ss:$8 sps:$4 sm:$0xff]  }
  0xbe   :  { %1553 = vmatmul.mubr.bf16.vlgmr.msra.gmra.mrb[4].mxu1 %v2674_v11  ;;  %1400 = vmatpush1.bf16.msra.mxu0 %v3310_v18  ;;  %v3394_v11 = vld [vmem:[#allocation4 + $0x5e0] ss:$16 sps:$4 sm:$0xff]  }
  0xbf   :  { %1562 = vmatpush1.bf16.msra.mxu1 %v3313_v19  ;;  %1401 = vmatprep.subr.bf16.mxu0 %v3318_v20  ;;  %v3408_v18 = vld [vmem:[#allocation7] ss:$8 sps:$4 sm:$0xff]   ;;  %v3407_v19 = vld [vmem:[#allocation4 + $0x60c] ss:$16 sps:$4 sm:$0xff]  }
  0xc0   :  { %1563 = vmatprep.subr.bf16.mxu1 %v3321_v21  ;;  %1593 = vmatprep.mubr.bf16.mxu1 %v2677_v17  ;;  %v3402_v17 = vld [vmem:[#allocation4 + $0x5e8] ss:$16 sps:$4 sm:$0xff]   ;;  %v3413_v20 = vld [vmem:[#allocation7 + $0x14] ss:$8 sps:$4 sm:$0xff]  }
  0xc1   :  { %v3405_v21 = vld [vmem:[#allocation4 + $0x608] ss:$16 sps:$4 sm:$0xff]  }
  0xc2   :  { %1402 = vmatpush1.bf16.msra.mxu0 %v3316_v22  ;;  %v3411_v22 = vld [vmem:[#allocation7 + $0x10] ss:$8 sps:$4 sm:$0xff]  }
  0xc3   :  { %1564 = vmatpush1.bf16.msra.mxu1 %v3319_v23  ;;  %1403 = vmatprep.subr.bf16.mxu0 %v3324_v24  ;;  %v3416_v23 = vld [vmem:[#allocation7 + $0x24] ss:$8 sps:$4 sm:$0xff]   ;;  %v3419_v24 = vld [vmem:[#allocation7 + $0x34] ss:$8 sps:$4 sm:$0xff]  }
  0xc4   :  { %1565 = vmatprep.subr.bf16.mxu1 %v3327_v25  ;;  %v3417_v25 = vld [vmem:[#allocation7 + $0x30] ss:$8 sps:$4 sm:$0xff]  }
  0xc6   :  { %1404 = vmatpush1.bf16.msra.mxu0 %v3322_v26  ;;  %v3422_v26 = vld [vmem:[#allocation7 + $0x44] ss:$8 sps:$4 sm:$0xff]  }
  0xc7   :  { %1566 = vmatpush1.bf16.msra.mxu1 %v3325_v27  ;;  %1405 = vmatprep.subr.bf16.mxu0 %v3330_v28  ;;  %v3420_v27 = vld [vmem:[#allocation7 + $0x40] ss:$8 sps:$4 sm:$0xff]   ;;  %v3425_v28 = vld [vmem:[#allocation7 + $0x54] ss:$8 sps:$4 sm:$0xff]  }
  0xc8   :  { %1567 = vmatprep.subr.bf16.mxu1 %v3333_v29  ;;  %v3536_v29 = vld [vmem:[%s3921_s1 + $0x18] ss:$0 sps:$4 sm:$0xff]  }
  0xca   :  { %1406 = vmatpush1.bf16.msra.mxu0 %v3328_v30  ;;  %v3428_v30 = vld [vmem:[#allocation7 + $0x64] ss:$8 sps:$4 sm:$0xff]  }
  0xcb   :  { %1568 = vmatpush1.bf16.msra.mxu1 %v3331_v31  ;;  %1407 = vmatprep.subr.bf16.mxu0 %v3336_v32  ;;  %v3426_v31 = vld [vmem:[#allocation7 + $0x60] ss:$8 sps:$4 sm:$0xff]  }
  0xcc   :  { %1569 = vmatprep.subr.bf16.mxu1 %v3339_v33  ;;  %v3431_v33 = vld [vmem:[#allocation7 + $0x74] ss:$8 sps:$4 sm:$0xff]  }
  0xce   :  { %1408 = vmatpush1.bf16.msra.mxu0 %v3334_v34 }
  0xcf   :  { %1570 = vmatpush1.bf16.msra.mxu1 %v3337_v35  ;;  %1409 = vmatprep.subr.bf16.mxu0 %v3342_v36 }
  0xd0   :  { %1571 = vmatprep.subr.bf16.mxu1 %v3345_v37  ;;  %v3429_v37 = vld [vmem:[#allocation7 + $0x70] ss:$8 sps:$4 sm:$0xff]  }
  0xd2   :  { %1410 = vmatpush1.bf16.msra.mxu0 %v3340_v38  ;;  %v3434_v38 = vld [vmem:[#allocation7 + $0x84] ss:$8 sps:$4 sm:$0xff]  }
  0xd3   :  { %1572 = vmatpush1.bf16.msra.mxu1 %v3343_v39  ;;  %1411 = vmatprep.subr.bf16.mxu0 %v3348_v40  ;;  %v3432_v39 = vld [vmem:[#allocation7 + $0x80] ss:$8 sps:$4 sm:$0xff]   ;;  %v3437_v40 = vld [vmem:[#allocation7 + $0x94] ss:$8 sps:$4 sm:$0xff]  }
  0xd4   :  { %1573 = vmatprep.subr.bf16.mxu1 %v3351_v41  ;;  %v3435_v41 = vld [vmem:[#allocation7 + $0x90] ss:$8 sps:$4 sm:$0xff]  }
  0xd6   :  { %1412 = vmatpush1.bf16.msra.mxu0 %v3346_v42  ;;  %v3440_v42 = vld [vmem:[#allocation7 + $0xa4] ss:$8 sps:$4 sm:$0xff]  }
  0xd7   :  { %1574 = vmatpush1.bf16.msra.mxu1 %v3349_v43  ;;  %1413 = vmatprep.subr.bf16.mxu0 %v3354_v44  ;;  %v3438_v43 = vld [vmem:[#allocation7 + $0xa0] ss:$8 sps:$4 sm:$0xff]   ;;  %v3443_v44 = vld [vmem:[#allocation7 + $0xb4] ss:$8 sps:$4 sm:$0xff]  }
  0xd8   :  { %1575 = vmatprep.subr.bf16.mxu1 %v3357_v45  ;;  %v3441_v45 = vld [vmem:[#allocation7 + $0xb0] ss:$8 sps:$4 sm:$0xff]  }
  0xda   :  { %1414 = vmatpush1.bf16.msra.mxu0 %v3352_v46  ;;  %v3446_v46 = vld [vmem:[#allocation7 + $0xc4] ss:$8 sps:$4 sm:$0xff]  }
  0xdb   :  { %1576 = vmatpush1.bf16.msra.mxu1 %v3355_v47  ;;  %1415 = vmatprep.subr.bf16.mxu0 %v3360_v48  ;;  %v3444_v47 = vld [vmem:[#allocation7 + $0xc0] ss:$8 sps:$4 sm:$0xff]   ;;  %v3449_v48 = vld [vmem:[#allocation7 + $0xd4] ss:$8 sps:$4 sm:$0xff]  }
  0xdc   :  { %1577 = vmatprep.subr.bf16.mxu1 %v3363_v49  ;;  %v3447_v49 = vld [vmem:[#allocation7 + $0xd0] ss:$8 sps:$4 sm:$0xff]  }
  0xde   :  { %1416 = vmatpush1.bf16.msra.mxu0 %v3358_v50  ;;  %v3452_v50 = vld [vmem:[#allocation7 + $0xe4] ss:$8 sps:$4 sm:$0xff]  }
  0xdf   :  { %1578 = vmatpush1.bf16.msra.mxu1 %v3361_v51  ;;  %1417 = vmatprep.subr.bf16.mxu0 %v3366_v52  ;;  %v3450_v51 = vld [vmem:[#allocation7 + $0xe0] ss:$8 sps:$4 sm:$0xff]   ;;  %v3455_v52 = vld [vmem:[#allocation7 + $0xf4] ss:$8 sps:$4 sm:$0xff]  }
  0xe0   :  { %1579 = vmatprep.subr.bf16.mxu1 %v3369_v53  ;;  %v3453_v53 = vld [vmem:[#allocation7 + $0xf0] ss:$8 sps:$4 sm:$0xff]  }
  0xe2   :  { %1418 = vmatpush1.bf16.msra.mxu0 %v3364_v54  ;;  %v3458_v54 = vld [vmem:[#allocation7 + $0x104] ss:$8 sps:$4 sm:$0xff]  }
  0xe3   :  { %1580 = vmatpush1.bf16.msra.mxu1 %v3367_v55  ;;  %1419 = vmatprep.subr.bf16.mxu0 %v3372_v56  ;;  %v287_v55 = vlaneseq }
  0xe4   :  { %1581 = vmatprep.subr.bf16.mxu1 %v3375_v57 }
  0xe5   :  { %v3780_v56 = vshrl.u32 %v287_v55, 7  ;;  %v3782_v57 = vand.u32 127, %v287_v55  ;;  %v285_v55 = vld [vmem:[%s3923_s3] sm:$0xf] }
  0xe6   :  { %1420 = vmatpush1.bf16.msra.mxu0 %v3370_v58 }
  0xe7   :  { %1582 = vmatpush1.bf16.msra.mxu1 %v3373_v59  ;;  %1421 = vmatprep.subr.bf16.mxu0 %v3378_v60  ;;  %v1652_v58 = vmul.u32 512, %v3780_v56  ;;  %v3786_v59 = vadd.s32 128, %v3782_v57 }
  0xe8   :  { %1583 = vmatprep.subr.bf16.mxu1 %v3381_v61  ;;  %v3504_v61 = vld [vmem:[#allocation9 + $0x40] sm:$0xff]  }
  0xe9   :  { %v1653_v60 = vadd.s32 %v1652_v58, %v3782_v57 }
  0xea   :  { %1422 = vmatpush1.bf16.msra.mxu0 %v3376_v62  ;;  %v3505_v62 = vld [vmem:[#allocation9] sm:$0xff]  }
  0xeb   :  { %1584 = vmatpush1.bf16.msra.mxu1 %v3379_v63  ;;  %1423 = vmatprep.subr.bf16.mxu0 %v3384_v1  ;;  %v3506_v63 = vld [vmem:[#allocation9 + $0x48] sm:$0xff]   ;;  %v3792_v1 = vstv %s3920_s0 }
  0xec   :  { %1585 = vmatprep.subr.bf16.mxu1 %v3387_v2  ;;  %v1654_v2 = vadd.s32 %v1652_v58, %v3786_v59 }
  0xee   :  { %1424 = vmatpush1.bf16.msra.mxu0 %v3382_v3  ;;  %v3507_v3 = vld [vmem:[#allocation9 + $0x8] sm:$0xff]  }
  0xef   :  { %1586 = vmatpush1.bf16.msra.mxu1 %v3385_v4  ;;  %1425 = vmatprep.subr.bf16.mxu0 %v3390_v5  ;;  %v1658_v4 = vadd.s32 %v3792_v1, %v1653_v60  ;;  %v3508_v5 = vld [vmem:[#allocation9 + $0x50] sm:$0xff]  }
  0xf0   :  { %1587 = vmatprep.subr.bf16.mxu1 %v3393_v6  ;;  %v1659_v6 = vadd.s32 %v3792_v1, %v1654_v2 }
  0xf2   :  { %1426 = vmatpush1.bf16.msra.mxu0 %v3388_v7  ;;  %v3509_v7 = vld [vmem:[#allocation9 + $0x10] sm:$0xff]  }
  0xf3   :  { %1588 = vmatpush1.bf16.msra.mxu1 %v3391_v8  ;;  %1427 = vmatprep.subr.bf16.mxu0 %v3396_v9  ;;  %v1662_v8 = vadd.s32 1, %v1658_v4  ;;  %v3510_v9 = vld [vmem:[#allocation9 + $0x58] sm:$0xff]  }
  0xf4   :  { %1589 = vmatprep.subr.bf16.mxu1 %v3399_v10  ;;  %v1663_v10 = vadd.s32 1, %v1659_v6 }
  0xf6   :  { %1428 = vmatpush1.bf16.msra.mxu0 %v3394_v11  ;;  %v1650_v11 = vadd.s32 256, %v3782_v57 }
  0xf7   :  { %1590 = vmatpush1.bf16.msra.mxu1 %v3397_v12  ;;  %2130 = vmatprep.subr.bf16.mxu0 %v3410_v14  ;;  %v3511_v12 = vld [vmem:[#allocation9 + $0x18] sm:$0xff]   ;;  %v1651_v14 = vadd.s32 384, %v3782_v57 }
  0xf8   :  { %1591 = vmatprep.subr.bf16.mxu1 %v3404_v13  ;;  %v1666_v13 = vshrl.u32 %v1662_v8, 16 }
  0xf9   :  { %1430 = vmatmul.mubr.bf16.vlgmr.msra.gmra.mrb[0].mxu0 %v2676_v15 }
  0xfa   :  { %2131 = vmatpush1.bf16.msra.mxu0 %v3408_v18  ;;  %v1655_v18 = vadd.s32 %v1652_v58, %v1650_v11 }
  0xfb   :  { %1592 = vmatpush1.bf16.msra.mxu1 %v3402_v17  ;;  %2132 = vmatprep.subr.bf16.mxu0 %v3413_v20  ;;  %v1667_v17 = vshrl.u32 %v1663_v10, 16  ;;  %v1670_v20 = vxor.u32 %v1666_v13, %v1662_v8 }
  0xfc   :  { %1602 = vmatprep.subr.bf16.mxu1 %v3407_v19  ;;  %v3513_v19 = vld [vmem:[#allocation9 + $0x20] sm:$0xff]  }
  0xfe   :  { %1594 = vmatmul.mubr.bf16.vlgmr.msra.gmra.mrb[4].mxu1 %v2676_v15  ;;  %2133 = vmatpush1.bf16.msra.mxu0 %v3411_v22  ;;  %v3512_v15 = vld [vmem:[#allocation9 + $0x60] sm:$0xff]   ;;  %v3514_v22 = vld [vmem:[#allocation9 + $0x68] sm:$0xff]  }
  0xff   :  { %1603 = vmatpush1.bf16.msra.mxu1 %v3405_v21  ;;  %1634 = vmatprep.mubr.bf16.mxu1 %v3640_v0  ;;  %v3423_v0 = vld [vmem:[#allocation7 + $0x50] ss:$8 sps:$4 sm:$0xff]   ;;  %v1656_v21 = vadd.s32 %v1652_v58, %v1651_v14  ;;  %v293_v58 = vsub.s32 1, %v3780_v56 }
 0x100   :  { %2134 = vmatprep.subr.bf16.mxu0 %v3416_v23  ;;  %2994 = vmatprep.subr.bf16.mxu1 %v3504_v61  ;;  %v1671_v23 = vxor.u32 %v1667_v17, %v1663_v10 }
 0x102   :  { %2135 = vmatpush1.bf16.msra.mxu0 %v3414_v16  ;;  %v1660_v16 = vadd.s32 %v3792_v1, %v1655_v18 }
 0x103   :  { %2136 = vmatprep.subr.bf16.mxu0 %v3419_v24  ;;  %v3515_v24 = vld [vmem:[#allocation9 + $0x28] sm:$0xff]  }
 0x106   :  { %2137 = vmatpush1.bf16.msra.mxu0 %v3417_v25  ;;  %v1674_v25 = vmul.u32 2246822507, %v1670_v20  ;;  %v3519_v20 = vld [vmem:[#allocation9 + $0x38] sm:$0xff]  }
 0x107   :  { %2138 = vmatprep.subr.bf16.mxu0 %v3422_v26  ;;  %v1661_v26 = vadd.s32 %v3792_v1, %v1656_v21 }
 0x10a   :  { %2876 = vmatmul.mubr.msk.bf16.vlgmr.msra.gmra.mrb[4].mxu1 %vm1311_vm0, %v3536_v29  ;;  %2139 = vmatpush1.bf16.msra.mxu0 %v3420_v27  ;;  %v1675_v27 = vmul.u32 2246822507, %v1671_v23  ;;  %v1678_v29 = vshrl.u32 %v1674_v25, 13 }
 0x10b   :  { %2140 = vmatprep.subr.bf16.mxu0 %v3425_v28  ;;  %2995 = vmatpush3.bf16.msra.mxu1 %v3505_v62  ;;  %v1664_v28 = vadd.s32 1, %v1660_v16 }
 0x10c   :  { %2996 = vmatprep.subr.bf16.mxu1 %v3506_v63 }
 0x10e   :  { %2141 = vmatpush1.bf16.msra.mxu0 %v3423_v0  ;;  %v1665_v0 = vadd.s32 1, %v1661_v26  ;;  %v301_v26 = vsub.s32 3, %v3780_v56 }
 0x10f   :  { %2142 = vmatprep.subr.bf16.mxu0 %v3428_v30  ;;  %2997 = vmatpush3.bf16.msra.mxu1 %v3507_v3  ;;  %v1679_v30 = vshrl.u32 %v1675_v27, 13  ;;  %v294_v3 = vrot.slane %v285_v55, %v293_v58 }
 0x110   :  { %2998 = vmatprep.subr.bf16.mxu1 %v3508_v5 }
 0x111   :  { %v3776_v32 = vpop.f32.mrb[0].mxu1 }
 0x112   :  { %v3778_v34 = vpop.f32.mrb[1].mxu1  ;;  %2143 = vmatpush1.bf16.msra.mxu0 %v3426_v31  ;;  %v1668_v31 = vshrl.u32 %v1664_v28, 16 }
 0x113   :  { %v1476_v35 = vpop.f32.mrb[2].mxu1  ;;  %2144 = vmatprep.subr.bf16.mxu0 %v3431_v33  ;;  %2999 = vmatpush3.bf16.msra.mxu1 %v3509_v7  ;;  %v1682_v33 = vxor.u32 %v1678_v29, %v1674_v25  ;;  %v297_v25 = vsub.s32 2, %v3780_v56 }
 0x114   :  { %v1477_v36 = vpop.f32.mrb[3].mxu1  ;;  %3000 = vmatprep.subr.bf16.mxu1 %v3510_v9  ;;  %v1669_v35 = vshrl.u32 %v1665_v0, 16 }
 0x115   :  { %v1683_v36 = vxor.u32 %v1679_v30, %v1675_v27  ;;  %v298_v29 = vrot.slane %v285_v55, %v297_v25  ;;  %v3464_v30 = vld [vmem:[#allocation7 + $0x124] ss:$8 sps:$4 sm:$0xff]  }
 0x116   :  { %2145 = vmatpush1.bf16.msra.mxu0 %v3429_v37  ;;  %v1672_v37 = vxor.u32 %v1668_v31, %v1664_v28  ;;  %v3459_v28 = vld [vmem:[#allocation7 + $0x110] ss:$8 sps:$4 sm:$0xff]   ;;  %v302_v31 = vrot.slane %v285_v55, %v301_v26 }
 0x117   :  { %2146 = vmatprep.subr.bf16.mxu0 %v3434_v38  ;;  %3001 = vmatpush3.bf16.msra.mxu1 %v3511_v12  ;;  %v1686_v38 = vmul.u32 3266489909, %v1682_v33 }
 0x118   :  { %3002 = vmatprep.subr.bf16.mxu1 %v3512_v15 }
 0x11a   :  { %2147 = vmatpush1.bf16.msra.mxu0 %v3432_v39  ;;  %v1673_v39 = vxor.u32 %v1669_v35, %v1665_v0 }
 0x11b   :  { %2148 = vmatprep.subr.bf16.mxu0 %v3437_v40  ;;  %3003 = vmatpush3.bf16.msra.mxu1 %v3513_v19  ;;  %v1687_v40 = vmul.u32 3266489909, %v1683_v36  ;;  %v3462_v36 = vld [vmem:[#allocation7 + $0x120] ss:$8 sps:$4 sm:$0xff]  }
 0x11c   :  { %3004 = vmatprep.subr.bf16.mxu1 %v3514_v22 }
 0x11e   :  { %2149 = vmatpush1.bf16.msra.mxu0 %v3435_v41  ;;  %v1676_v41 = vmul.u32 2246822507, %v1672_v37 }
 0x11f   :  { %2150 = vmatprep.subr.bf16.mxu0 %v3440_v42  ;;  %3005 = vmatpush3.bf16.msra.mxu1 %v3515_v24  ;;  %v1690_v42 = vshrl.u32 %v1686_v38, 16  ;;  %v3461_v24 = vld [vmem:[#allocation7 + $0x114] ss:$8 sps:$4 sm:$0xff]  }
 0x122   :  { %2151 = vmatpush1.bf16.msra.mxu0 %v3438_v43  ;;  %v1677_v43 = vmul.u32 2246822507, %v1673_v39  ;;  %v3467_v39 = vld [vmem:[#allocation7 + $0x134] ss:$8 sps:$4 sm:$0xff]  }
 0x123   :  { %2152 = vmatprep.subr.bf16.mxu0 %v3443_v44  ;;  %v1691_v44 = vshrl.u32 %v1687_v40, 16 }
 0x126   :  { %2153 = vmatpush1.bf16.msra.mxu0 %v3441_v45  ;;  %v1680_v45 = vshrl.u32 %v1676_v41, 13 }
 0x127   :  { %2154 = vmatprep.subr.bf16.mxu0 %v3446_v46  ;;  %v1694_v46 = vxor.u32 %v1690_v42, %v1686_v38 }
 0x12a   :  { %2155 = vmatpush1.bf16.msra.mxu0 %v3444_v47  ;;  %v1681_v47 = vshrl.u32 %v1677_v43, 13 }
 0x12b   :  { %2156 = vmatprep.subr.bf16.mxu0 %v3449_v48  ;;  %v1695_v48 = vxor.u32 %v1691_v44, %v1687_v40 }
 0x12e   :  { %2157 = vmatpush1.bf16.msra.mxu0 %v3447_v49  ;;  %v1684_v49 = vxor.u32 %v1680_v45, %v1676_v41  ;;  %v3465_v45 = vld [vmem:[#allocation7 + $0x130] ss:$8 sps:$4 sm:$0xff]  }
 0x12f   :  { %2158 = vmatprep.subr.bf16.mxu0 %v3452_v50  ;;  %v1698_v50 = vshrl.u32 %v1694_v46, 8  ;;  %v3470_v46 = vld [vmem:[#allocation7 + $0x144] ss:$8 sps:$4 sm:$0xff]  }
 0x131   :  { %v1702_v60 = vcvt.s32.f32 %v1698_v50  ;;  %v3471_v50 = vld [vmem:[#allocation7 + $0x150] ss:$8 sps:$4 sm:$0xff]  }
 0x132   :  { %2159 = vmatpush1.bf16.msra.mxu0 %v3450_v51  ;;  %v1685_v51 = vxor.u32 %v1681_v47, %v1677_v43 }
 0x133   :  { %2160 = vmatprep.subr.bf16.mxu0 %v3455_v52  ;;  %v1699_v52 = vshrl.u32 %v1695_v48, 8  ;;  %v1706_v4 = vmul.f32 5.9604645e-08, %v1702_v60  ;;  %v3468_v48 = vld [vmem:[#allocation7 + $0x140] ss:$8 sps:$4 sm:$0xff]   ;;  %v3482_v60 = vld [vmem:[#allocation7 + $0x184] ss:$8 sps:$4 sm:$0xff]  }
 0x134   :  { %v1689_v61 = vmul.u32 3266489909, %v1685_v51  ;;  %v3476_v51 = vld [vmem:[#allocation7 + $0x164] ss:$8 sps:$4 sm:$0xff]  }
 0x135   :  { %v1703_v62 = vcvt.s32.f32 %v1699_v52  ;;  %vm1710_vm1 = vcmp.ge.f32.partialorder %v1706_v4, 0.2  ;;  %v3474_v52 = vld [vmem:[#allocation7 + $0x160] ss:$8 sps:$4 sm:$0xff]   ;;  %v3491_v4 = vld [vmem:[#allocation7 + $0x1b4] ss:$8 sps:$4 sm:$0xff]  }
 0x136   :  { %2161 = vmatpush1.bf16.msra.mxu0 %v3453_v53  ;;  %v289_v53 = vsub.s32 0, %v3780_v56  ;;  %v1693_v5 = vshrl.u32 %v1689_v61, 16 }
 0x137   :  { %2171 = vmatprep.subr.bf16.mxu0 %v3458_v54  ;;  %v1688_v54 = vmul.u32 3266489909, %v1684_v49  ;;  %v1707_v7 = vmul.f32 5.9604645e-08, %v1703_v62  ;;  %v3473_v49 = vld [vmem:[#allocation7 + $0x154] ss:$8 sps:$4 sm:$0xff]  }
 0x138   :  { %v290_v63 = vrot.slane %v285_v55, %v289_v53  ;;  %v1697_v15 = vxor.u32 %v1693_v5, %v1689_v61  ;;  %v3477_v55 = vld [vmem:[#allocation7 + $0x170] ss:$8 sps:$4 sm:$0xff]   ;;  %v3480_v61 = vld [vmem:[#allocation7 + $0x180] ss:$8 sps:$4 sm:$0xff]   ;;  %v3485_v62 = vld [vmem:[#allocation7 + $0x194] ss:$8 sps:$4 sm:$0xff]  }
 0x139   :  { %v1692_v2 = vshrl.u32 %v1688_v54, 16  ;;  %vm1711_vm2 = vcmp.ge.f32.partialorder %v1707_v7, 0.2  ;;  %v3489_v5 = vld [vmem:[#allocation7 + $0x1b0] ss:$8 sps:$4 sm:$0xff]  }
 0x13a   :  { %v1701_v22 = vshrl.u32 %v1697_v15, 8  ;;  %v3492_v7 = vld [vmem:[#allocation7 + $0x1c0] ss:$8 sps:$4 sm:$0xff]  }
 0x13b   :  { %v1696_v10 = vxor.u32 %v1692_v2, %v1688_v54  ;;  %v3479_v54 = vld [vmem:[#allocation7 + $0x174] ss:$8 sps:$4 sm:$0xff]   ;;  %v3488_v2 = vld [vmem:[#allocation7 + $0x1a4] ss:$8 sps:$4 sm:$0xff]  }
 0x13c   :  { %v1705_v27 = vcvt.s32.f32 %v1701_v22  ;;  %v2212_v22 = vmul.u32 256, %v3780_v56 }
 0x13d   :  { %v1700_v19 = vshrl.u32 %v1696_v10, 8  ;;  %v3500_v10 = vld [vmem:[#allocation7 + $0x1e4] ss:$8 sps:$4 sm:$0xff]  }
 0x13e   :  { %v1709_v33 = vmul.f32 5.9604645e-08, %v1705_v27 }
 0x140   :  { %vm1713_vm11 = vcmp.ge.f32.partialorder %v1709_v33, 0.2 }
 0x1cc   :  { %v1431_v6 = vpop.f32.mrb[0].mxu0 }
 0x1cd   :  { %v3062_v8 = vadd.f32 %v1431_v6, %v290_v63  ;;  %v1433_v9 = vpop.f32.mrb[1].mxu0  ;;  %v3483_v63 = vld [vmem:[#allocation7 + $0x190] ss:$8 sps:$4 sm:$0xff]   ;;  %v3494_v6 = vld [vmem:[#allocation7 + $0x1c4] ss:$8 sps:$4 sm:$0xff]  }
 0x1ce   :  { %v3064_v11 = vadd.f32 %v1433_v9, %v294_v3  ;;  %v1435_v12 = vpop.f32.mrb[2].mxu0  ;;  %v3486_v3 = vld [vmem:[#allocation7 + $0x1a0] ss:$8 sps:$4 sm:$0xff]   ;;  %v3495_v9 = vld [vmem:[#allocation7 + $0x1d0] ss:$8 sps:$4 sm:$0xff]  }
 0x1cf   :  { %v3063_v13 = vadd.f32 %v3062_v8, %v3776_v32  ;;  %v1436_v14 = vpop.f32.mrb[3].mxu0  ;;  %v3456_v32 = vld [vmem:[#allocation7 + $0x100] ss:$8 sps:$4 sm:$0xff]   ;;  %v3497_v8 = vld [vmem:[#allocation7 + $0x1d4] ss:$8 sps:$4 sm:$0xff]  }
 0x1d0   :  { %v3065_v17 = vadd.f32 %v3064_v11, %v3778_v34  ;;  %v1704_v34 = vcvt.s32.f32 %v1700_v19  ;;  %v3498_v11 = vld [vmem:[#allocation7 + $0x1e0] ss:$8 sps:$4 sm:$0xff]   ;;  %v3503_v12 = vld [vmem:[#allocation7 + $0x1f4] ss:$8 sps:$4 sm:$0xff]  }
 0x1d1   :  { %vm1714_vm3 = vcmp.gt.f32.partialorder %v3063_v13, 0.0  ;;  %v1722_v18 = vmul.f32 1.25, %v3063_v13  ;;  %v3501_v13 = vld [vmem:[#allocation7 + $0x1f0] ss:$8 sps:$4 sm:$0xff]  }
 0x1d2   :  { %vm3812_vm4 = vmand %vm1710_vm1, %vm1714_vm3  ;;  %vm1715_vm5 = vcmp.gt.f32.partialorder %v3065_v17, 0.0  ;;  %v1723_v21 = vmul.f32 1.25, %v3065_v17  ;;  %v1708_v0 = vmul.f32 5.9604645e-08, %v1704_v34  ;;  %v3516_v17 = vld [vmem:[#allocation9 + $0x70] sm:$0xff]   ;;  %v3518_v19 = vld [vmem:[#allocation9 + $0x78] sm:$0xff]  }
 0x1d3   :  { %vm1719_vm6 = vmand %vm1711_vm2, %vm1715_vm5  ;;  %v2945_v16 = vpack.c.bf16 %v1722_v18, %v1722_v18  ;;  %v3517_v18 = vld [vmem:[#allocation9 + $0x30] sm:$0xff]   ;;  %3006 = vmatprep.subr.bf16.mxu1 %v3516_v17 }
 0x1d4   :  { %v2942_v23 = vpack.c.bf16 %v1723_v21, %v1723_v21  ;;  %vm2941_vm7 = vmpackc.low %vm1719_vm6, %vm1719_vm6  ;;  %vm1712_vm9 = vcmp.ge.f32.partialorder %v1708_v0, 0.2  ;;  %3007 = vmatpush3.bf16.msra.mxu1 %v3517_v18  ;;  %v3641_v21 = vmov 0.0  }
 0x1d5   :  { %vm2944_vm8 = vmpackc.low %vm3812_vm4, %vm3812_vm4  ;;  %3008 = vmatprep.subr.bf16.mxu1 %v3518_v19 }
 0x1d6   :  { %2943 = vmatprep.mubr.msk.bf16.mxu0 %vm2941_vm7, %v2942_v23  ;;  %v2213_v23 = vadd.s32 %v2212_v22, %v3782_v57 }
 0x1d7   :  { %2946 = vmatmul.mubr.msk.bf16.vlgmr.msra.gmra.mrb[4].mxu0 %vm2944_vm8, %v2945_v16 }
 0x1d8   :  { %2172 = vmatpush1.bf16.msra.mxu0 %v3456_v32  ;;  %3009 = vmatpush3.bf16.msra.mxu1 %v3519_v20  ;;  %v2214_v32 = vadd.s32 %v2212_v22, %v3786_v59  ;;  %v2215_v16 = vadd.s32 %v2213_v23, %v3792_v1 }
 0x1d9   :  { %2173 = vmatprep.subr.bf16.mxu0 %v3461_v24  ;;  %3030 = vmatprep.subr.bf16.mxu1 %v3641_v21 }
 0x1da   :  { %v2216_v24 = vadd.s32 %v2214_v32, %v3792_v1  ;;  %v2217_v25 = vadd.s32 2, %v2215_v16 }
 0x1dc   :  { %2174 = vmatpush1.bf16.msra.mxu0 %v3459_v28  ;;  %v2218_v34 = vadd.s32 2, %v2216_v24  ;;  %v2219_v26 = vshrl.u32 %v2217_v25, 16 }
 0x1dd   :  { %v1636_v35 = vpop.f32.mrb[4].mxu1  ;;  %2175 = vmatprep.subr.bf16.mxu0 %v3464_v30 }
 0x1de   :  { %v3821_v37 = vadd.f32 %v1636_v35, %v298_v29  ;;  %v1638_v38 = vpop.f32.mrb[5].mxu1  ;;  %v2220_v27 = vshrl.u32 %v2218_v34, 16  ;;  %v2221_v28 = vxor.u32 %v2219_v26, %v2217_v25 }
 0x1df   :  { %v3067_v40 = vadd.f32 %v1638_v38, %v302_v31  ;;  %v1640_v41 = vpop.f32.mrb[6].mxu1 }
 0x1e0   :  { %vm1716_vm10 = vcmp.gt.f32.partialorder %v3821_v37, 0.0  ;;  %v1641_v42 = vpop.f32.mrb[7].mxu1  ;;  %2176 = vmatpush1.bf16.msra.mxu0 %v3462_v36  ;;  %v1724_v14 = vmul.f32 1.25, %v3821_v37  ;;  %v2222_v29 = vxor.u32 %v2220_v27, %v2218_v34  ;;  %v2223_v0 = vmul.u32 2246822507, %v2221_v28 }
 0x1e1   :  { %vm3824_vm12 = vmand %vm1712_vm9, %vm1716_vm10  ;;  %vm1717_vm13 = vcmp.gt.f32.partialorder %v3067_v40, 0.0  ;;  %v1725_v44 = vmul.f32 1.25, %v3067_v40  ;;  %2177 = vmatprep.subr.bf16.mxu0 %v3467_v39  ;;  %vm3642_vm9 = vmmov 0  }
 0x1e2   :  { %vm1721_vm14 = vmand %vm1713_vm11, %vm1717_vm13  ;;  %v2951_v15 = vpack.c.bf16 %v1724_v14, %v1724_v14  ;;  %v2224_v30 = vmul.u32 2246822507, %v2222_v29  ;;  %v2225_v31 = vshrl.u32 %v2223_v0, 13  ;;  %v3528_v29 = vld [vmem:[%s3930_s10] sm:$0xff]  }
 0x1e3   :  { %v2948_v47 = vpack.c.bf16 %v1725_v44, %v1725_v44  ;;  %vm2947_vm15 = vmpackc.low %vm1721_vm14, %vm1721_vm14  ;;  %v1798_v44 = vld [vmem:[%s3925_s5] sm:$0x3]  ;;  %vm2601_vm14 = vcmask 523264  }
 0x1e4   :  { %2178 = vmatpush1.bf16.msra.mxu0 %v3465_v45  ;;  %vm2950_vm0 = vmpackc.low %vm3824_vm12, %vm3824_vm12  ;;  %v2226_v33 = vshrl.u32 %v2224_v30, 13  ;;  %v2227_v35 = vxor.u32 %v2225_v31, %v2223_v0  ;;  %v3530_v31 = vld [vmem:[%s3930_s10 + $0x10] sm:$0xff]  }
 0x1e5   :  { %2949 = vmatprep.mubr.msk.bf16.mxu0 %vm2947_vm15, %v2948_v47  ;;  %2179 = vmatprep.subr.bf16.mxu0 %v3470_v46  ;;  %v1803_v47 = vrot.slane %v1798_v44, %v289_v53 }
 0x1e6   :  { %v2228_v36 = vxor.u32 %v2226_v33, %v2224_v30  ;;  %v2229_v37 = vmul.u32 3266489909, %v2227_v35  ;;  %v3529_v30 = vld [vmem:[%s3930_s10 + $0x8] sm:$0xff]   ;;  %v3531_v33 = vld [vmem:[%s3930_s10 + $0x18] sm:$0xff]   ;;  %v2976_v35 = vld [vmem:[%s3929_s9] ss:$0 sm:$0xff] }
 0x1e7   :  { %s3643_s9 = smov [#allocation10]  }
 0x1e8   :  { %2180 = vmatpush1.bf16.msra.mxu0 %v3468_v48  ;;  %v2230_v38 = vmul.u32 3266489909, %v2228_v36  ;;  %v2231_v39 = vshrl.u32 %v2229_v37, 16  ;;  %s2662_s10 = sshll.u32 %s3643_s9, 4  ;;  %s2663_s10 = int_to_ptr.vmem [resolvable:$true] %s2662_s10 }
 0x1e9   :  { %2181 = vmatprep.subr.bf16.mxu0 %v3473_v49  ;;  %v1807_v49 = vrot.slane %v1798_v44, %v293_v58  ;;  %v3520_v58 = vld [vmem:[%s3928_s8] sm:$0xff]   ;;  %p3608_p11 = scmp.lt.s32.totalorder %s2663_s10, %s2663_s10 }
 0x1ea   :  { %v2232_v59 = vshrl.u32 %v2230_v38, 16  ;;  %v2233_v40 = vxor.u32 %v2231_v39, %v2229_v37 }
 0x1ec   :  { %2182 = vmatpush1.bf16.msra.mxu0 %v3471_v50  ;;  %v2234_v41 = vxor.u32 %v2232_v59, %v2230_v38  ;;  %v2235_v42 = vshrl.u32 %v2233_v40, 8 }
 0x1ed   :  { %2183 = vmatprep.subr.bf16.mxu0 %v3476_v51 }
 0x1ee   :  { %v2236_v43 = vshrl.u32 %v2234_v41, 8  ;;  %v2237_v45 = vcvt.s32.f32 %v2235_v42 }
 0x1f0   :  { %2184 = vmatpush1.bf16.msra.mxu0 %v3474_v52  ;;  %v2238_v46 = vcvt.s32.f32 %v2236_v43  ;;  %v2239_v48 = vmul.f32 5.9604645e-08, %v2237_v45 }
 0x1f1   :  { %2185 = vmatprep.subr.bf16.mxu0 %v3479_v54 }
 0x1f2   :  { %v2240_v50 = vmul.f32 5.9604645e-08, %v2238_v46  ;;  %vm2241_vm1 = vcmp.ge.f32.partialorder %v2239_v48, 0.4 }
 0x1f4   :  { %2186 = vmatpush1.bf16.msra.mxu0 %v3477_v55  ;;  %vm2242_vm3 = vcmp.ge.f32.partialorder %v2240_v50, 0.4 }
 0x1f5   :  { %2187 = vmatprep.subr.bf16.mxu0 %v3482_v60 }
 0x1f8   :  { %2188 = vmatpush1.bf16.msra.mxu0 %v3480_v61 }
 0x1f9   :  { %2189 = vmatprep.subr.bf16.mxu0 %v3485_v62 }
 0x1fc   :  { %2190 = vmatpush1.bf16.msra.mxu0 %v3483_v63 }
 0x1fd   :  { %2191 = vmatprep.subr.bf16.mxu0 %v3488_v2 }
 0x200   :  { %2192 = vmatpush1.bf16.msra.mxu0 %v3486_v3  ;;  %v3521_v3 = vld [vmem:[%s3928_s8 + $0x8] sm:$0xff]  }
 0x201   :  { %2193 = vmatprep.subr.bf16.mxu0 %v3491_v4  ;;  %v3522_v4 = vld [vmem:[%s3928_s8 + $0x10] sm:$0xff]  }
 0x204   :  { %2194 = vmatpush1.bf16.msra.mxu0 %v3489_v5  ;;  %v3523_v5 = vld [vmem:[%s3928_s8 + $0x18] sm:$0xff]  }
 0x205   :  { %2195 = vmatprep.subr.bf16.mxu0 %v3494_v6  ;;  %v3524_v6 = vld [vmem:[%s3928_s8 + $0x20] sm:$0xff]  }
 0x208   :  { %2196 = vmatpush1.bf16.msra.mxu0 %v3492_v7  ;;  %v3525_v7 = vld [vmem:[%s3928_s8 + $0x28] sm:$0xff]  }
 0x209   :  { %2197 = vmatprep.subr.bf16.mxu0 %v3497_v8  ;;  %v3526_v8 = vld [vmem:[%s3928_s8 + $0x30] sm:$0xff]  }
 0x20c   :  { %2198 = vmatpush1.bf16.msra.mxu0 %v3495_v9  ;;  %v3527_v9 = vld [vmem:[%s3928_s8 + $0x38] sm:$0xff]  }
 0x20d   :  { %2199 = vmatprep.subr.bf16.mxu0 %v3500_v10  ;;  %v2428_v10 = vmul.u32 128, %v3780_v56  ;;  %v2953_v56 = vld [vmem:[%s3927_s7] ss:$0 sm:$0xff] }
 0x210   :  { %2200 = vmatpush1.bf16.msra.mxu0 %v3498_v11  ;;  %v2429_v11 = vadd.s32 %v2428_v10, %v3782_v57 }
 0x211   :  { %2201 = vmatprep.subr.bf16.mxu0 %v3503_v12 }
 0x212   :  { %v2430_v12 = vadd.s32 %v2429_v11, %v3792_v1 }
 0x214   :  { %2202 = vmatpush1.bf16.msra.mxu0 %v3501_v13  ;;  %v2431_v13 = vadd.s32 3, %v2430_v12 }
 0x216   :  { %v2432_v14 = vshrl.u32 %v2431_v13, 16 }
 0x217   :  { %2952 = vmatmul.mubr.msk.bf16.vlgmr.msra.gmra.mrb[4].mxu0 %vm2950_vm0, %v2951_v15 }
 0x218   :  { %v2433_v15 = vxor.u32 %v2432_v14, %v2431_v13 }
 0x21a   :  { %v2434_v17 = vmul.u32 2246822507, %v2433_v15 }
 0x21c   :  { %v2435_v18 = vshrl.u32 %v2434_v17, 13 }
 0x21e   :  { %v2436_v19 = vxor.u32 %v2435_v18, %v2434_v17 }
 0x220   :  { %v2437_v20 = vmul.u32 3266489909, %v2436_v19 }
 0x222   :  { %v2438_v22 = vshrl.u32 %v2437_v20, 16 }
 0x224   :  { %v2439_v23 = vxor.u32 %v2438_v22, %v2437_v20 }
 0x226   :  { %v2440_v32 = vshrl.u32 %v2439_v23, 8 }
 0x228   :  { %v2441_v16 = vcvt.s32.f32 %v2440_v32 }
 0x22a   :  { %v2442_v25 = vmul.f32 5.9604645e-08, %v2441_v16 }
 0x22c   :  { %vm2443_vm10 = vcmp.ge.f32.partialorder %v2442_v25, 0.2 }
 0x2ea   :  { %v2205_v51 = vpop.f32.mrb[4].mxu0 }
 0x2eb   :  { %v3068_v52 = vadd.f32 %v2205_v51, %v1803_v47  ;;  %v2207_v54 = vpop.f32.mrb[5].mxu0 }
 0x2ec   :  { %v3069_v55 = vadd.f32 %v2207_v54, %v1807_v49  ;;  %v2209_v60 = vpop.f32.mrb[6].mxu0 }
 0x2ed   :  { %vm2243_vm2 = vcmp.gt.f32.partialorder %v3068_v52, 0.0  ;;  %v2247_v61 = vmul.f32 1.6666666, %v3068_v52  ;;  %v2210_v62 = vpop.f32.mrb[7].mxu0 }
 0x2ee   :  { %vm2244_vm4 = vcmp.gt.f32.partialorder %v3069_v55, 0.0  ;;  %v2248_v63 = vmul.f32 1.6666666, %v3069_v55  ;;  %vm2245_vm5 = vmand %vm2241_vm1, %vm2243_vm2 }
 0x2ef   :  { %vm2246_vm6 = vmand %vm2242_vm3, %vm2244_vm4  ;;  %v2974_v2 = vpack.c.bf16 %v2247_v61, %v2247_v61 }
 0x2f0   :  { %v2971_v53 = vpack.c.bf16 %v2248_v63, %v2248_v63  ;;  %vm2970_vm7 = vmpackc.low %vm2246_vm6, %vm2246_vm6 }
 0x2f1   :  { %vm2973_vm8 = vmpackc.low %vm2245_vm5, %vm2245_vm5 }
 0x2f2   :  { %2972 = vmatprep.mubr.msk.bf16.mxu1 %vm2970_vm7, %v2971_v53 }
 0x2f3   :  { %2975 = vmatmul.mubr.msk.bf16.vlgmr.msra.gmra.mrb[8].mxu1 %vm2973_vm8, %v2974_v2 }
 0x2f4   :  { %3031 = vmatpush3.bf16.msra.mxu1 %v3520_v58  ;;  %3046 = vmatprep.mubr.msk.bf16.mxu1 %vm3642_vm9, %v3641_v21 }
 0x2f5   :  { %3032 = vmatprep.subr.bf16.mxu1 %v3641_v21 }
 0x2f8   :  { %3033 = vmatpush3.bf16.msra.mxu1 %v3521_v3 }
 0x2f9   :  { %3034 = vmatprep.subr.bf16.mxu1 %v3641_v21 }
 0x2fc   :  { %3035 = vmatpush3.bf16.msra.mxu1 %v3522_v4 }
 0x2fd   :  { %3036 = vmatprep.subr.bf16.mxu1 %v3641_v21 }
 0x300   :  { %3037 = vmatpush3.bf16.msra.mxu1 %v3523_v5 }
 0x301   :  { %3038 = vmatprep.subr.bf16.mxu1 %v3641_v21 }
 0x304   :  { %3039 = vmatpush3.bf16.msra.mxu1 %v3524_v6 }
 0x305   :  { %3040 = vmatprep.subr.bf16.mxu1 %v3641_v21 }
 0x308   :  { %3041 = vmatpush3.bf16.msra.mxu1 %v3525_v7 }
 0x309   :  { %3042 = vmatprep.subr.bf16.mxu1 %v3641_v21 }
 0x30c   :  { %3043 = vmatpush3.bf16.msra.mxu1 %v3526_v8 }
 0x30d   :  { %3044 = vmatprep.subr.bf16.mxu1 %v3641_v21 }
 0x310   :  { %3045 = vmatpush3.bf16.msra.mxu1 %v3527_v9 }
 0x311   :  { %3050 = vmatprep.subr.bf16.mxu1 %v3641_v21 }
 0x3c6   :  { %v3010_v24 = vpop.f32.mrb[8].mxu1 }
 0x3c7   :  { %v3011_v57 = vpop.f32.mrb[9].mxu1 }
 0x3c8   :  { %v3012_v34 = vadd.f32 %v3011_v57, %v3010_v24  ;;  %v3013_v1 = vpop.f32.mrb[10].mxu1 }
 0x3c9   :  { %v3014_v26 = vpop.f32.mrb[11].mxu1 }
 0x3ca   :  { %v2423_v27 = vadd.f32 %v3012_v34, %v2953_v56 }
 0x3cc   :  { %vm2444_vm11 = vcmp.gt.f32.partialorder %v2423_v27, 0.0  ;;  %v2446_v28 = vmul.f32 1.25, %v2423_v27 }
 0x3cd   :  { %vm2445_vm12 = vmand %vm2443_vm10, %vm2444_vm11 }
 0x3ce   :  { %v2986_v0 = vpack.c.bf16 %v2446_v28, %v2446_v28  ;;  %vm2985_vm13 = vmpackc.low %vm2445_vm12, %vm2445_vm12 }
 0x3d0   :  { %3047 = vmatmul.mubr.msk.bf16.vlgmr.msra.gmra.mrb[12].mxu1 %vm2985_vm13, %v2986_v0 }
 0x3d1   :  { %3051 = vmatpush3.bf16.msra.mxu1 %v3528_v29  ;;  %3058 = vmatprep.mubr.msk.bf16.mxu1 %vm3642_vm9, %v3641_v21 }
 0x3d2   :  { %3052 = vmatprep.subr.bf16.mxu1 %v3641_v21 }
 0x3d5   :  { %3053 = vmatpush3.bf16.msra.mxu1 %v3529_v30 }
 0x3d6   :  { %3054 = vmatprep.subr.bf16.mxu1 %v3641_v21 }
 0x3d9   :  { %3055 = vmatpush3.bf16.msra.mxu1 %v3530_v31 }
 0x3da   :  { %3056 = vmatprep.subr.bf16.mxu1 %v3641_v21  ;;  %v2988_v21 = vld [vmem:[%s3931_s11] ss:$0 sm:$0xff]  ;;  %s3603_s11 = scalar_lea.vmem %s2663_s10, 128 }
 0x3db   :  { %p3604_p10 = scmp.ne.s32.totalorder %s2663_s10, %s3603_s11  ;;  %p3609_p12 = scmp.lt.s32.totalorder %s3603_s11, %s3603_s11 }
 0x3dd   :  { %3057 = vmatpush3.bf16.msra.mxu1 %v3531_v33  ;;  %p3610_p13 = por %p3609_p12, %p3608_p11 }
 0x3df   :  { %p3611_p0 = pnand %p3610_p13, %p3604_p10 }
 0x4a3   :  { %v2554_v36 = vpop.f32.mrb[12].mxu1 }
 0x4a4   :  { %v2555_v37 = vadd.f32 %v2976_v35, %v2554_v36  ;;  %v3048_v38 = vpop.f32.mrb[13].mxu1 }
 0x4a5   :  { %v2557_v39 = vpop.f32.mrb[14].mxu1 }
 0x4a6   :  { %v2560_v59 = vmax.f32 %v2555_v37, 0.0  ;;  %v3049_v40 = vpop.f32.mrb[15].mxu1 }
 0x4a8   :  { %v2561_v41 = vpack.c.bf16 %v2560_v59, %v2560_v59 }
 0x4aa   :  { %3059 = vmatmul.mubr.msk.bf16.vlgmr.msra.gmra.mrb[16].mxu1 %vm2601_vm14, %v2561_v41 }
 0x57d   :  { %v2639_v42 = vpop.f32.mrb[16].mxu1 }
 0x57e   :  { %v2640_v43 = vadd.f32 %v2988_v21, %v2639_v42  ;;  %v3060_v44 = vpop.f32.mrb[17].mxu1 }
 0x57f   :  { %v2642_v45 = vpop.f32.mrb[18].mxu1 }
 0x580   :  { %2645 = vmax.xlane.f32.xlu0 %v2640_v43  ;;  %v3061_v46 = vpop.f32.mrb[19].mxu1 }
 0x60d   :  { %v2646_v47 = vpop.xlane.xlu0 %2645 }
 0x60e   :  { %v2647_v48 = vsub.f32 %v2640_v43, %v2646_v47 }
 0x610   :  { %v2648_v49 = vmul.f32 1.442695, %v2647_v48 }
 0x612   :  { %3532 = vpow2.f32 %v2648_v49 }
 0x61c   :  { %v3533_v50 = vpop.eup %3532 }
 0x61d   :  { %2650 = vadd.xlane.f32.xlu0 %v3533_v50 }
 0x6aa   :  { %v2651_v51 = vpop.xlane.xlu0 %2650 }
 0x6ab   :  { %3534 = vlog2.f32 %v2651_v51 }
 0x6b5   :  { %v3535_v52 = vpop.eup %3534 }
 0x6b6   :  { %v2653_v54 = vmul.f32 0.6931472, %v3535_v52 }
 0x6b8   :  { %v2654_v55 = vsub.f32 %v2647_v48, %v2653_v54 }
 0x6ba   :  { %2655 = vst [vmem:[#allocation10] sm:$0xff] %v2654_v55 }
 0x6bb   :  { %3614 = shalt.err (!%p3611_p0)
}
 0x6bc   :  { %s3615_s2 = scalar_lea.hbm %s3932_s12, 128 }
 0x6bd   :  { %p3616_p1 = scmp.ne.s32.totalorder %s3932_s12, %s3615_s2  ;;  %p3619_p2 = scmp.lt.u32.totalorder %s3615_s2, %s3932_s12 }
 0x6bf   :  { %p3621_p3 = pnand %p3619_p2, %p3616_p1 }
 0x6c1   :  { %3624 = shalt.err (!%p3621_p3)
}
 0x6c2   :  { %2665 = dma.vmem_to_hbm [thread:$0]  %s2663_s10, 128, %s3932_s12, [#allocation6]  }
 0x6c3   :  { %3629 = dma.done.wait [#allocation6], 128  }
 0x6c4   :  { %3630 = vsyncadd [#allocation6], 4294967168 }
 0x6c5   :  { %2669 = vsyncpa [#allocation5], 1 }
 0x6c6   :  { %2670 = vsyncpa [#allocation8], 1 }
 0x6c7   :  { %2671 = vsyncpa [#allocation6], 1 }

</bundles_post_ra>
